<compile_context>
chip_gen: v7x
topology: tpu7x:2x2x1
jax: 0.10.0
libtpu: 0.0.40
codegen_flags: <defaults>
</compile_context>

<pallas_src>
import jax
import jax.numpy as jnp
from jax.experimental import pallas as pl
from jax.experimental.pallas import tpu as pltpu


# ----------------------------- kernel -----------------------------
def _topdown_kernel(
    # batch-tiled inputs
    xt_ref, fc_ref, att_feats_ref, p_att_ref, h_state_ref, c_state_ref,
    # att_lstm fused weights: rows = [w_h; w_fc; w_x; w_hh]  -> (3R+E, 4R)
    w_att_ref, b_att_ref,
    # attention params
    w_h2att_ref, b_h2att_ref, w_alpha_ref,
    # lang_lstm fused weights: rows = [w_a; w_h; w_hh] -> (3R, 4R)
    w_lang_ref, b_lang_ref,
    # outputs (stacked new state)
    h_out_ref, c_out_ref,
):
    R = h_state_ref.shape[-1]
    E = xt_ref.shape[-1]
    mdt = w_att_ref.dtype          # MXU operand dtype (bf16 in production)
    f32 = jnp.float32

    def lstm_cell(gates, c_prev):
        # PyTorch nn.LSTMCell gate order: [i, f, g, o]
        i = jax.nn.sigmoid(gates[:, 0 * R:1 * R])
        f = jax.nn.sigmoid(gates[:, 1 * R:2 * R])
        g = jnp.tanh(gates[:, 2 * R:3 * R])
        o = jax.nn.sigmoid(gates[:, 3 * R:4 * R])
        c_new = f * c_prev + i * g
        h_new = o * jnp.tanh(c_new)
        return h_new, c_new

    h_att_prev = h_state_ref[0]     # state[0][0]
    h_lang_prev = h_state_ref[1]    # state[0][1] == prev_h (= state[0][-1])
    c_att_prev = c_state_ref[0]     # state[1][0]
    c_lang_prev = c_state_ref[1]    # state[1][1]

    # ---------- att_lstm: fused weight, split-K bf16 dots, f32 accumulation ----------
    # (split dots against static slices of the fused weight avoid materializing
    #  a (TB, 3R+E) concatenated copy in VMEM)
    gates_att = (
        jnp.dot(h_lang_prev.astype(mdt), w_att_ref[0:R, :],
                preferred_element_type=f32)
        + jnp.dot(fc_ref[...].astype(mdt), w_att_ref[R:2 * R, :],
                  preferred_element_type=f32)
        + jnp.dot(xt_ref[...].astype(mdt), w_att_ref[2 * R:2 * R + E, :],
                  preferred_element_type=f32)
        + jnp.dot(h_att_prev.astype(mdt), w_att_ref[2 * R + E:, :],
                  preferred_element_type=f32)
        + b_att_ref[...]
    )
    h_att, c_att = lstm_cell(gates_att, c_att_prev)

    # ---------- additive attention (all elementwise math in f32) ----------
    att_h = (
        jnp.dot(h_att.astype(mdt), w_h2att_ref[...], preferred_element_type=f32)
        + b_h2att_ref[...]
    )                                                              # (TB, A)
    dot3 = jnp.tanh(p_att_ref[...].astype(f32) + att_h[:, None, :])   # (TB,N,A)
    # alpha_net bias dropped: a constant shift cancels in the softmax.
    scores = jnp.sum(dot3 * w_alpha_ref[...][None, :, :], axis=-1)     # (TB,N)
    scores = scores - jnp.max(scores, axis=-1, keepdims=True)
    exp_s = jnp.exp(scores)
    weight = exp_s / jnp.sum(exp_s, axis=-1, keepdims=True)            # exact
    # Context as a VPU weighted sum: an M=1 batched MXU matmul would waste
    # 255/256 MXU rows and contend with the gate GEMMs on the vex slot.
    att_res = jnp.sum(weight[:, :, None] * att_feats_ref[...].astype(f32),
                      axis=1)                                          # (TB,R)

    # ---------- lang_lstm: fused weight, split-K bf16 dots ----------
    gates_lang = (
        jnp.dot(att_res.astype(mdt), w_lang_ref[0:R, :],
                preferred_element_type=f32)
        + jnp.dot(h_att.astype(mdt), w_lang_ref[R:2 * R, :],
                  preferred_element_type=f32)
        + jnp.dot(h_lang_prev.astype(mdt), w_lang_ref[2 * R:, :],
                  preferred_element_type=f32)
        + b_lang_ref[...]
    )
    h_lang, c_lang = lstm_cell(gates_lang, c_lang_prev)

    # F.dropout(h_lang, p, training=False) -> identity (inference semantics).
    # TODO(synk): training-mode stochastic dropout not implemented (would use
    # pltpu.prng_seed / pltpu.prng_random_bits).
    h_out_ref[0] = h_att.astype(h_out_ref.dtype)
    h_out_ref[1] = h_lang.astype(h_out_ref.dtype)
    c_out_ref[0] = c_att.astype(c_out_ref.dtype)
    c_out_ref[1] = c_lang.astype(c_out_ref.dtype)


# ----------------------------- wrapper -----------------------------
def prepare_topdown_params(params, *, mxu_dtype=jnp.bfloat16):
    """One-time (outside the decode loop) weight fusion + bf16 cast.

    Fused row order must match the in-kernel split-dot order:
      w_att  = [w_att_h; w_att_fc; w_att_x; w_att_hh]   (3R+E, 4R)
      w_lang = [w_lang_a; w_lang_h; w_lang_hh]          (3R,   4R)
    alpha_net bias is intentionally dropped (constant shift cancels in softmax).
    """
    f32 = jnp.float32
    w_att = jnp.concatenate(
        [params["w_att_h"], params["w_att_fc"], params["w_att_x"],
         params["w_att_hh"]], axis=0).astype(mxu_dtype)
    w_lang = jnp.concatenate(
        [params["w_lang_a"], params["w_lang_h"], params["w_lang_hh"]],
        axis=0).astype(mxu_dtype)
    return dict(
        w_att=w_att,
        b_att=params["b_att"].astype(f32),
        w_h2att=params["w_h2att"].astype(mxu_dtype),
        b_h2att=params["b_h2att"].astype(f32),
        w_alpha=params["w_alpha"].astype(f32),
        w_lang=w_lang,
        b_lang=params["b_lang"].astype(f32),
    )


def _pick_batch_tile(B, batch_tile):
    TB = min(B, batch_tile)
    # v7x megacore: prefer >= 2 grid steps so dimension_semantics=("parallel",)
    # can shard the batch across the two TensorCores, provided the halved tile
    # keeps the sublane (multiple-of-8) alignment.
    if TB == B and B >= 32 and (B // 2) % 8 == 0:
        TB = B // 2
    return TB


def _default_vmem_limit_bytes():
    # ~100 MiB on 128 MiB parts (v5e/v6e), ~51 MiB on 64 MiB parts (v7x).
    try:
        cap = pltpu.get_tpu_info().vmem_capacity_bytes
    except Exception:
        cap = 128 * 1024 * 1024
    return int(min(100 * 1024 * 1024, int(cap * 0.8)))


def topdown_core(xt, fc_feats, att_feats, p_att_feats, state, fused_params, *,
                 batch_tile=128, weight_buffer_count=1, vmem_limit_bytes=None):
    """One TopDownCore forward step, batch-tiled over a Pallas grid.

    Tile sizing guidance (production R/A ~ 512-1024, N ~ 36-196):
      v5e: batch_tile=128 (matches the 4x128x128 MXU), v6e: 256, v7x: 128
      with bf16 features (64 if features stay f32).
    att_feats / p_att_feats may be passed in bf16 (recommended) or f32; weights
    in `fused_params` come from prepare_topdown_params (bf16, fused once).
    For best effect wrap the call in jax.jit(..., donate_argnums=<state arg>)
    so the in->out state aliasing avoids a defensive copy.
    B not a multiple of the batch tile is handled (clipped partial-tile
    writes), but prefer B padded to a multiple of 8.
    """
    h_state, c_state = state
    B, R = h_state.shape[1], h_state.shape[2]
    E = xt.shape[1]
    N = att_feats.shape[1]
    A = p_att_feats.shape[2]

    TB = _pick_batch_tile(B, batch_tile)
    grid = (pl.cdiv(B, TB),)
    if vmem_limit_bytes is None:
        vmem_limit_bytes = _default_vmem_limit_bytes()

    batch2 = lambda b: (b, 0)
    batch3 = lambda b: (b, 0, 0)
    state_map = lambda b: (0, b, 0)
    const2 = lambda b: (0, 0)      # weights: resident across grid steps

    # Constant-index weight/bias blocks: single-buffer them so the resident
    # copy is not duplicated by the default double-buffered pipeline.
    wpm = pl.Buffered(weight_buffer_count) if weight_buffer_count else None
    wspec = lambda shape: pl.BlockSpec(shape, const2, pipeline_mode=wpm)

    in_specs = [
        pl.BlockSpec((TB, E), batch2),             # xt
        pl.BlockSpec((TB, R), batch2),             # fc_feats
        pl.BlockSpec((TB, N, R), batch3),          # att_feats   (bf16 ok)
        pl.BlockSpec((TB, N, A), batch3),          # p_att_feats (bf16 ok)
        pl.BlockSpec((2, TB, R), state_map),       # h_state
        pl.BlockSpec((2, TB, R), state_map),       # c_state
        wspec((3 * R + E, 4 * R)),                 # w_att (fused, bf16)
        wspec((1, 4 * R)),                         # b_att
        wspec((R, A)),                             # w_h2att (bf16)
        wspec((1, A)),                             # b_h2att
        wspec((1, A)),                             # w_alpha
        wspec((3 * R, 4 * R)),                     # w_lang (fused, bf16)
        wspec((1, 4 * R)),                         # b_lang
    ]
    out_specs = (
        pl.BlockSpec((2, TB, R), state_map),       # stacked h (h_att, h_lang)
        pl.BlockSpec((2, TB, R), state_map),       # stacked c (c_att, c_lang)
    )
    out_shapes = (
        jax.ShapeDtypeStruct((2, B, R), h_state.dtype),
        jax.ShapeDtypeStruct((2, B, R), c_state.dtype),
    )

    h_out, c_out = pl.pallas_call(
        _topdown_kernel,
        grid=grid,
        in_specs=in_specs,
        out_specs=out_specs,
        out_shape=out_shapes,
        # Alias old state -> new state: no fresh (2,B,R) HBM buffers per step
        # (pair with donate_argnums at the jit boundary to make it real).
        input_output_aliases={4: 0, 5: 1},
        compiler_params=pltpu.CompilerParams(
            dimension_semantics=("parallel",),
            vmem_limit_bytes=int(vmem_limit_bytes),
        ),
    )(xt, fc_feats, att_feats, p_att_feats, h_state, c_state,
      fused_params["w_att"], fused_params["b_att"],
      fused_params["w_h2att"], fused_params["b_h2att"], fused_params["w_alpha"],
      fused_params["w_lang"], fused_params["b_lang"])

    # output = F.dropout(h_lang, p, training=False) == h_lang == h_out[1]
    return h_out[1], (h_out, c_out)


# ------------- pure-JAX reference (mirrors the PyTorch forward) -------------
def topdown_core_ref(xt, fc_feats, att_feats, p_att_feats, state, params):
    h_state, c_state = state
    R = h_state.shape[-1]

    def lstm_cell(gates, c_prev):
        i = jax.nn.sigmoid(gates[:, 0 * R:1 * R])
        f = jax.nn.sigmoid(gates[:, 1 * R:2 * R])
        g = jnp.tanh(gates[:, 2 * R:3 * R])
        o = jax.nn.sigmoid(gates[:, 3 * R:4 * R])
        c_new = f * c_prev + i * g
        return o * jnp.tanh(c_new), c_new

    prev_h = h_state[1]
    gates_att = (prev_h @ params["w_att_h"] + fc_feats @ params["w_att_fc"]
                 + xt @ params["w_att_x"] + h_state[0] @ params["w_att_hh"]
                 + params["b_att"])
    h_att, c_att = lstm_cell(gates_att, c_state[0])

    att_h = h_att @ params["w_h2att"] + params["b_h2att"]
    dot = jnp.tanh(p_att_feats + att_h[:, None, :])
    scores = (jnp.sum(dot * params["w_alpha"][None, :, :], axis=-1)
              + params["b_alpha"][0, 0])
    weight = jax.nn.softmax(scores, axis=-1)
    att_res = jnp.einsum("bn,bnr->br", weight, att_feats)

    gates_lang = (att_res @ params["w_lang_a"] + h_att @ params["w_lang_h"]
                  + h_state[1] @ params["w_lang_hh"] + params["b_lang"])
    h_lang, c_lang = lstm_cell(gates_lang, c_state[1])
    return h_lang, (jnp.stack([h_att, h_lang]), jnp.stack([c_att, c_lang]))


if __name__ == "__main__":
    # Small shapes consistent with the module:
    #   input_encoding_size E = 32, rnn_size R = 32, att_hid_size A = 32
    #   batch B = 2, number of attended regions N (att_size) = 8
    B, E, R, A, N = 2, 32, 32, 32, 8

    key = jax.random.PRNGKey(0)
    ks = jax.random.split(key, 20)
    u = lambda k, shape, s: jax.random.uniform(k, shape, jnp.float32, -s, s)

    raw_params = {
        # att_lstm (input = [prev_h(R), fc(R), xt(E)] -> 4R gates)
        "w_att_h":  u(ks[0], (R, 4 * R), 0.1),
        "w_att_fc": u(ks[1], (R, 4 * R), 0.1),
        "w_att_x":  u(ks[2], (E, 4 * R), 0.1),
        "w_att_hh": u(ks[3], (R, 4 * R), 0.1),
        "b_att":    u(ks[4], (1, 4 * R), 0.1),
        # attention
        "w_h2att":  u(ks[5], (R, A), 0.1),
        "b_h2att":  u(ks[6], (1, A), 0.1),
        "w_alpha":  u(ks[7], (1, A), 0.1),
        "b_alpha":  u(ks[8], (1, 1), 0.1),   # cancels in softmax (ref only)
        # lang_lstm (input = [att_res(R), h_att(R)] -> 4R gates)
        "w_lang_a":  u(ks[9], (R, 4 * R), 0.1),
        "w_lang_h":  u(ks[10], (R, 4 * R), 0.1),
        "w_lang_hh": u(ks[11], (R, 4 * R), 0.1),
        "b_lang":    u(ks[12], (1, 4 * R), 0.1),
    }

    xt = u(ks[13], (B, E), 1.0)
    fc_feats = u(ks[14], (B, R), 1.0)
    att_feats = u(ks[15], (B, N, R), 1.0)
    p_att_feats = u(ks[16], (B, N, A), 1.0)
    h0 = u(ks[17], (2, B, R), 1.0)
    c0 = u(ks[18], (2, B, R), 1.0)

    # f32 reference first (the kernel call donates the state buffers).
    out_r, (h_r, c_r) = topdown_core_ref(xt, fc_feats, att_feats, p_att_feats,
                                         (h0, c0), raw_params)

    # One-time (outside any decode loop): fuse + bf16-cast the weights and
    # store the precomputed attention features in bf16 for streaming.
    fused = prepare_topdown_params(raw_params)
    att_feats_bf16 = att_feats.astype(jnp.bfloat16)
    p_att_feats_bf16 = p_att_feats.astype(jnp.bfloat16)

    step = jax.jit(
        topdown_core, donate_argnums=(4,),
        static_argnames=("batch_tile", "weight_buffer_count", "vmem_limit_bytes"))

    try:
        out, (h_new, c_new) = step(xt, fc_feats, att_feats_bf16,
                                   p_att_feats_bf16, (h0, c0), fused)
    except Exception:
        # Fallback for jax builds where pl.Buffered on pallas_call in_specs is
        # not plumbed through: use default (double-buffered) weight blocks.
        out, (h_new, c_new) = step(xt, fc_feats, att_feats_bf16,
                                   p_att_feats_bf16, (h0, c0), fused,
                                   weight_buffer_count=0)
    jax.block_until_ready((out, h_new, c_new))

    # bf16 MXU operands + bf16 feature streaming vs f32 reference.
    assert jnp.allclose(out, out_r, atol=2e-2, rtol=2e-2)
    assert jnp.allclose(h_new, h_r, atol=2e-2, rtol=2e-2)
    assert jnp.allclose(c_new, c_r, atol=2e-2, rtol=2e-2)

    print("KERNEL_OK")
</pallas_src>

<mosaic_0001>
module attributes {stable_mosaic.version = 11 : i64} {
  func.func @_topdown_kernel(%arg0: i32, %arg1: memref<2x32xf32, #tpu.memory_space<vmem>>, %arg2: memref<2x32xf32, #tpu.memory_space<vmem>>, %arg3: memref<2x8x32xbf16, #tpu.memory_space<vmem>>, %arg4: memref<2x8x32xbf16, #tpu.memory_space<vmem>>, %arg5: memref<2x2x32xf32, #tpu.memory_space<vmem>>, %arg6: memref<2x2x32xf32, #tpu.memory_space<vmem>>, %arg7: memref<128x128xbf16, #tpu.memory_space<vmem>>, %arg8: memref<1x128xf32, #tpu.memory_space<vmem>>, %arg9: memref<32x32xbf16, #tpu.memory_space<vmem>>, %arg10: memref<1x32xf32, #tpu.memory_space<vmem>>, %arg11: memref<1x32xf32, #tpu.memory_space<vmem>>, %arg12: memref<96x128xbf16, #tpu.memory_space<vmem>>, %arg13: memref<1x128xf32, #tpu.memory_space<vmem>>, %arg14: memref<2x2x32xf32, #tpu.memory_space<vmem>>, %arg15: memref<2x2x32xf32, #tpu.memory_space<vmem>>) attributes {dimension_semantics = [#tpu.dimension_semantics<parallel>], iteration_bounds = array<i64: 1>, scalar_prefetch = 0 : i64, scratch_operands = 0 : i64, tpu.core_type = #tpu.core_type<tc>, window_params = [{transform_indices = @transform_0, window_bounds = array<i64: 2, 32>}, {transform_indices = @transform_1, window_bounds = array<i64: 2, 32>}, {transform_indices = @transform_2, window_bounds = array<i64: 2, 8, 32>}, {transform_indices = @transform_3, window_bounds = array<i64: 2, 8, 32>}, {transform_indices = @transform_4, window_bounds = array<i64: 2, 2, 32>}, {transform_indices = @transform_5, window_bounds = array<i64: 2, 2, 32>}, {pipeline_mode = #tpu.pipeline_mode<synchronous>, transform_indices = @transform_6, window_bounds = array<i64: 128, 128>}, {pipeline_mode = #tpu.pipeline_mode<synchronous>, transform_indices = @transform_7, window_bounds = array<i64: 1, 128>}, {pipeline_mode = #tpu.pipeline_mode<synchronous>, transform_indices = @transform_8, window_bounds = array<i64: 32, 32>}, {pipeline_mode = #tpu.pipeline_mode<synchronous>, transform_indices = @transform_9, window_bounds = array<i64: 1, 32>}, {pipeline_mode = #tpu.pipeline_mode<synchronous>, transform_indices = @transform_10, window_bounds = array<i64: 1, 32>}, {pipeline_mode = #tpu.pipeline_mode<synchronous>, transform_indices = @transform_11, window_bounds = array<i64: 96, 128>}, {pipeline_mode = #tpu.pipeline_mode<synchronous>, transform_indices = @transform_12, window_bounds = array<i64: 1, 128>}, {transform_indices = @transform_13, window_bounds = array<i64: 2, 2, 32>}, {transform_indices = @transform_14, window_bounds = array<i64: 2, 2, 32>}]} {
    %c0 = arith.constant 0 : index
    %c0_0 = arith.constant 0 : index
    %c0_1 = arith.constant 0 : index
    %0 = vector.load %arg5[%c0, %c0_0, %c0_1] : memref<2x2x32xf32, #tpu.memory_space<vmem>>, vector<1x2x32xf32>
    %1 = vector.shape_cast %0 : vector<1x2x32xf32> to vector<2x32xf32>
    %c1 = arith.constant 1 : index
    %c0_2 = arith.constant 0 : index
    %c0_3 = arith.constant 0 : index
    %2 = vector.load %arg5[%c1, %c0_2, %c0_3] : memref<2x2x32xf32, #tpu.memory_space<vmem>>, vector<1x2x32xf32>
    %3 = vector.shape_cast %2 : vector<1x2x32xf32> to vector<2x32xf32>
    %c0_4 = arith.constant 0 : index
    %c0_5 = arith.constant 0 : index
    %c0_6 = arith.constant 0 : index
    %4 = vector.load %arg6[%c0_4, %c0_5, %c0_6] : memref<2x2x32xf32, #tpu.memory_space<vmem>>, vector<1x2x32xf32>
    %5 = vector.shape_cast %4 : vector<1x2x32xf32> to vector<2x32xf32>
    %c1_7 = arith.constant 1 : index
    %c0_8 = arith.constant 0 : index
    %c0_9 = arith.constant 0 : index
    %6 = vector.load %arg6[%c1_7, %c0_8, %c0_9] : memref<2x2x32xf32, #tpu.memory_space<vmem>>, vector<1x2x32xf32>
    %7 = vector.shape_cast %6 : vector<1x2x32xf32> to vector<2x32xf32>
    %8 = arith.truncf %3 : vector<2x32xf32> to vector<2x32xbf16>
    %c0_10 = arith.constant 0 : index
    %c0_11 = arith.constant 0 : index
    %9 = vector.load %arg7[%c0_10, %c0_11] : memref<128x128xbf16, #tpu.memory_space<vmem>>, vector<32x128xbf16>
    %cst = arith.constant dense<0.000000e+00> : vector<2x128xf32>
    %10 = tpu.matmul %8, %9, %cst {dimension_numbers = #tpu.dot_dimension_numbers<[1], [0], [0], [1], [0, 0, 1, 1], [], []>} : vector<2x32xbf16>, vector<32x128xbf16>, vector<2x128xf32> -> vector<2x128xf32>
    %c0_12 = arith.constant 0 : index
    %c0_13 = arith.constant 0 : index
    %11 = vector.load %arg2[%c0_12, %c0_13] : memref<2x32xf32, #tpu.memory_space<vmem>>, vector<2x32xf32>
    %12 = arith.truncf %11 : vector<2x32xf32> to vector<2x32xbf16>
    %c32 = arith.constant 32 : index
    %c0_14 = arith.constant 0 : index
    %13 = vector.load %arg7[%c32, %c0_14] : memref<128x128xbf16, #tpu.memory_space<vmem>>, vector<32x128xbf16>
    %cst_15 = arith.constant dense<0.000000e+00> : vector<2x128xf32>
    %14 = tpu.matmul %12, %13, %cst_15 {dimension_numbers = #tpu.dot_dimension_numbers<[1], [0], [0], [1], [0, 0, 1, 1], [], []>} : vector<2x32xbf16>, vector<32x128xbf16>, vector<2x128xf32> -> vector<2x128xf32>
    %15 = arith.addf %10, %14 : vector<2x128xf32>
    %c0_16 = arith.constant 0 : index
    %c0_17 = arith.constant 0 : index
    %16 = vector.load %arg1[%c0_16, %c0_17] : memref<2x32xf32, #tpu.memory_space<vmem>>, vector<2x32xf32>
    %17 = arith.truncf %16 : vector<2x32xf32> to vector<2x32xbf16>
    %c64 = arith.constant 64 : index
    %c0_18 = arith.constant 0 : index
    %18 = vector.load %arg7[%c64, %c0_18] : memref<128x128xbf16, #tpu.memory_space<vmem>>, vector<32x128xbf16>
    %cst_19 = arith.constant dense<0.000000e+00> : vector<2x128xf32>
    %19 = tpu.matmul %17, %18, %cst_19 {dimension_numbers = #tpu.dot_dimension_numbers<[1], [0], [0], [1], [0, 0, 1, 1], [], []>} : vector<2x32xbf16>, vector<32x128xbf16>, vector<2x128xf32> -> vector<2x128xf32>
    %20 = arith.addf %15, %19 : vector<2x128xf32>
    %21 = arith.truncf %1 : vector<2x32xf32> to vector<2x32xbf16>
    %c96 = arith.constant 96 : index
    %c0_20 = arith.constant 0 : index
    %22 = vector.load %arg7[%c96, %c0_20] : memref<128x128xbf16, #tpu.memory_space<vmem>>, vector<32x128xbf16>
    %cst_21 = arith.constant dense<0.000000e+00> : vector<2x128xf32>
    %23 = tpu.matmul %21, %22, %cst_21 {dimension_numbers = #tpu.dot_dimension_numbers<[1], [0], [0], [1], [0, 0, 1, 1], [], []>} : vector<2x32xbf16>, vector<32x128xbf16>, vector<2x128xf32> -> vector<2x128xf32>
    %24 = arith.addf %20, %23 : vector<2x128xf32>
    %c0_22 = arith.constant 0 : index
    %c0_23 = arith.constant 0 : index
    %25 = vector.load %arg8[%c0_22, %c0_23] : memref<1x128xf32, #tpu.memory_space<vmem>>, vector<1x128xf32>
    %26 = vector.broadcast %25 : vector<1x128xf32> to vector<2x128xf32>
    %27 = arith.addf %24, %26 : vector<2x128xf32>
    %28 = vector.extract_strided_slice %27 {offsets = [0, 0], sizes = [2, 32], strides = [1, 1]} : vector<2x128xf32> to vector<2x32xf32>
    %29 = arith.negf %28 : vector<2x32xf32>
    %30 = math.exp %29 : vector<2x32xf32>
    %cst_24 = arith.constant 1.000000e+00 : f32
    %31 = vector.broadcast %cst_24 : f32 to vector<2x32xf32>
    %32 = arith.addf %31, %30 : vector<2x32xf32>
    %33 = arith.divf %31, %32 : vector<2x32xf32>
    %34 = vector.extract_strided_slice %27 {offsets = [0, 32], sizes = [2, 32], strides = [1, 1]} : vector<2x128xf32> to vector<2x32xf32>
    %35 = arith.negf %34 : vector<2x32xf32>
    %36 = math.exp %35 : vector<2x32xf32>
    %cst_25 = arith.constant 1.000000e+00 : f32
    %37 = vector.broadcast %cst_25 : f32 to vector<2x32xf32>
    %38 = arith.addf %37, %36 : vector<2x32xf32>
    %39 = arith.divf %37, %38 : vector<2x32xf32>
    %40 = vector.extract_strided_slice %27 {offsets = [0, 64], sizes = [2, 32], strides = [1, 1]} : vector<2x128xf32> to vector<2x32xf32>
    %41 = math.tanh %40 : vector<2x32xf32>
    %42 = vector.extract_strided_slice %27 {offsets = [0, 96], sizes = [2, 32], strides = [1, 1]} : vector<2x128xf32> to vector<2x32xf32>
    %43 = arith.negf %42 : vector<2x32xf32>
    %44 = math.exp %43 : vector<2x32xf32>
    %cst_26 = arith.constant 1.000000e+00 : f32
    %45 = vector.broadcast %cst_26 : f32 to vector<2x32xf32>
    %46 = arith.addf %45, %44 : vector<2x32xf32>
    %47 = arith.divf %45, %46 : vector<2x32xf32>
    %48 = arith.mulf %39, %5 : vector<2x32xf32>
    %49 = arith.mulf %33, %41 : vector<2x32xf32>
    %50 = arith.addf %48, %49 : vector<2x32xf32>
    %51 = math.tanh %50 : vector<2x32xf32>
    %52 = arith.mulf %47, %51 : vector<2x32xf32>
    %53 = arith.truncf %52 : vector<2x32xf32> to vector<2x32xbf16>
    %c0_27 = arith.constant 0 : index
    %c0_28 = arith.constant 0 : index
    %54 = vector.load %arg9[%c0_27, %c0_28] : memref<32x32xbf16, #tpu.memory_space<vmem>>, vector<32x32xbf16>
    %cst_29 = arith.constant dense<0.000000e+00> : vector<2x32xf32>
    %55 = tpu.matmul %53, %54, %cst_29 {dimension_numbers = #tpu.dot_dimension_numbers<[1], [0], [0], [1], [0, 0, 1, 1], [], []>} : vector<2x32xbf16>, vector<32x32xbf16>, vector<2x32xf32> -> vector<2x32xf32>
    %c0_30 = arith.constant 0 : index
    %c0_31 = arith.constant 0 : index
    %56 = vector.load %arg10[%c0_30, %c0_31] : memref<1x32xf32, #tpu.memory_space<vmem>>, vector<1x32xf32>
    %57 = vector.broadcast %56 : vector<1x32xf32> to vector<2x32xf32>
    %58 = arith.addf %55, %57 : vector<2x32xf32>
    %c0_32 = arith.constant 0 : index
    %c0_33 = arith.constant 0 : index
    %c0_34 = arith.constant 0 : index
    %59 = vector.load %arg4[%c0_32, %c0_33, %c0_34] : memref<2x8x32xbf16, #tpu.memory_space<vmem>>, vector<2x8x32xbf16>
    %60 = arith.extf %59 : vector<2x8x32xbf16> to vector<2x8x32xf32>
    %61 = vector.shape_cast %58 : vector<2x32xf32> to vector<2x1x32xf32>
    %62 = vector.broadcast %61 : vector<2x1x32xf32> to vector<2x8x32xf32>
    %63 = arith.addf %60, %62 : vector<2x8x32xf32>
    %64 = math.tanh %63 : vector<2x8x32xf32>
    %c0_35 = arith.constant 0 : index
    %c0_36 = arith.constant 0 : index
    %65 = vector.load %arg11[%c0_35, %c0_36] : memref<1x32xf32, #tpu.memory_space<vmem>>, vector<1x32xf32>
    %66 = vector.shape_cast %65 : vector<1x32xf32> to vector<1x1x32xf32>
    %67 = vector.broadcast %66 : vector<1x1x32xf32> to vector<2x8x32xf32>
    %68 = arith.mulf %64, %67 : vector<2x8x32xf32>
    %cst_37 = arith.constant dense<0.000000e+00> : vector<2x8xf32>
    %69 = vector.multi_reduction <add>, %68, %cst_37 [2] : vector<2x8x32xf32> to vector<2x8xf32>
    %cst_38 = arith.constant dense<0xFF800000> : vector<2xf32>
    %70 = vector.multi_reduction <maximumf>, %69, %cst_38 [1] : vector<2x8xf32> to vector<2xf32>
    %71 = vector.shape_cast %70 : vector<2xf32> to vector<2x1xf32>
    %72 = vector.broadcast %71 : vector<2x1xf32> to vector<2x8xf32>
    %73 = arith.subf %69, %72 : vector<2x8xf32>
    %74 = math.exp %73 : vector<2x8xf32>
    %cst_39 = arith.constant dense<0.000000e+00> : vector<2xf32>
    %75 = vector.multi_reduction <add>, %74, %cst_39 [1] : vector<2x8xf32> to vector<2xf32>
    %76 = vector.shape_cast %75 : vector<2xf32> to vector<2x1xf32>
    %77 = vector.broadcast %76 : vector<2x1xf32> to vector<2x8xf32>
    %78 = arith.divf %74, %77 : vector<2x8xf32>
    %79 = vector.shape_cast %78 : vector<2x8xf32> to vector<2x8x1xf32>
    %c0_40 = arith.constant 0 : index
    %c0_41 = arith.constant 0 : index
    %c0_42 = arith.constant 0 : index
    %80 = vector.load %arg3[%c0_40, %c0_41, %c0_42] : memref<2x8x32xbf16, #tpu.memory_space<vmem>>, vector<2x8x32xbf16>
    %81 = arith.extf %80 : vector<2x8x32xbf16> to vector<2x8x32xf32>
    %82 = vector.broadcast %79 : vector<2x8x1xf32> to vector<2x8x32xf32>
    %83 = arith.mulf %82, %81 : vector<2x8x32xf32>
    %cst_43 = arith.constant dense<0.000000e+00> : vector<2x32xf32>
    %84 = vector.multi_reduction <add>, %83, %cst_43 [1] : vector<2x8x32xf32> to vector<2x32xf32>
    %85 = arith.truncf %84 : vector<2x32xf32> to vector<2x32xbf16>
    %c0_44 = arith.constant 0 : index
    %c0_45 = arith.constant 0 : index
    %86 = vector.load %arg12[%c0_44, %c0_45] : memref<96x128xbf16, #tpu.memory_space<vmem>>, vector<32x128xbf16>
    %cst_46 = arith.constant dense<0.000000e+00> : vector<2x128xf32>
    %87 = tpu.matmul %85, %86, %cst_46 {dimension_numbers = #tpu.dot_dimension_numbers<[1], [0], [0], [1], [0, 0, 1, 1], [], []>} : vector<2x32xbf16>, vector<32x128xbf16>, vector<2x128xf32> -> vector<2x128xf32>
    %88 = arith.truncf %52 : vector<2x32xf32> to vector<2x32xbf16>
    %c32_47 = arith.constant 32 : index
    %c0_48 = arith.constant 0 : index
    %89 = vector.load %arg12[%c32_47, %c0_48] : memref<96x128xbf16, #tpu.memory_space<vmem>>, vector<32x128xbf16>
    %cst_49 = arith.constant dense<0.000000e+00> : vector<2x128xf32>
    %90 = tpu.matmul %88, %89, %cst_49 {dimension_numbers = #tpu.dot_dimension_numbers<[1], [0], [0], [1], [0, 0, 1, 1], [], []>} : vector<2x32xbf16>, vector<32x128xbf16>, vector<2x128xf32> -> vector<2x128xf32>
    %91 = arith.addf %87, %90 : vector<2x128xf32>
    %92 = arith.truncf %3 : vector<2x32xf32> to vector<2x32xbf16>
    %c64_50 = arith.constant 64 : index
    %c0_51 = arith.constant 0 : index
    %93 = vector.load %arg12[%c64_50, %c0_51] : memref<96x128xbf16, #tpu.memory_space<vmem>>, vector<32x128xbf16>
    %cst_52 = arith.constant dense<0.000000e+00> : vector<2x128xf32>
    %94 = tpu.matmul %92, %93, %cst_52 {dimension_numbers = #tpu.dot_dimension_numbers<[1], [0], [0], [1], [0, 0, 1, 1], [], []>} : vector<2x32xbf16>, vector<32x128xbf16>, vector<2x128xf32> -> vector<2x128xf32>
    %95 = arith.addf %91, %94 : vector<2x128xf32>
    %c0_53 = arith.constant 0 : index
    %c0_54 = arith.constant 0 : index
    %96 = vector.load %arg13[%c0_53, %c0_54] : memref<1x128xf32, #tpu.memory_space<vmem>>, vector<1x128xf32>
    %97 = vector.broadcast %96 : vector<1x128xf32> to vector<2x128xf32>
    %98 = arith.addf %95, %97 : vector<2x128xf32>
    %99 = vector.extract_strided_slice %98 {offsets = [0, 0], sizes = [2, 32], strides = [1, 1]} : vector<2x128xf32> to vector<2x32xf32>
    %100 = arith.negf %99 : vector<2x32xf32>
    %101 = math.exp %100 : vector<2x32xf32>
    %cst_55 = arith.constant 1.000000e+00 : f32
    %102 = vector.broadcast %cst_55 : f32 to vector<2x32xf32>
    %103 = arith.addf %102, %101 : vector<2x32xf32>
    %104 = arith.divf %102, %103 : vector<2x32xf32>
    %105 = vector.extract_strided_slice %98 {offsets = [0, 32], sizes = [2, 32], strides = [1, 1]} : vector<2x128xf32> to vector<2x32xf32>
    %106 = arith.negf %105 : vector<2x32xf32>
    %107 = math.exp %106 : vector<2x32xf32>
    %cst_56 = arith.constant 1.000000e+00 : f32
    %108 = vector.broadcast %cst_56 : f32 to vector<2x32xf32>
    %109 = arith.addf %108, %107 : vector<2x32xf32>
    %110 = arith.divf %108, %109 : vector<2x32xf32>
    %111 = vector.extract_strided_slice %98 {offsets = [0, 64], sizes = [2, 32], strides = [1, 1]} : vector<2x128xf32> to vector<2x32xf32>
    %112 = math.tanh %111 : vector<2x32xf32>
    %113 = vector.extract_strided_slice %98 {offsets = [0, 96], sizes = [2, 32], strides = [1, 1]} : vector<2x128xf32> to vector<2x32xf32>
    %114 = arith.negf %113 : vector<2x32xf32>
    %115 = math.exp %114 : vector<2x32xf32>
    %cst_57 = arith.constant 1.000000e+00 : f32
    %116 = vector.broadcast %cst_57 : f32 to vector<2x32xf32>
    %117 = arith.addf %116, %115 : vector<2x32xf32>
    %118 = arith.divf %116, %117 : vector<2x32xf32>
    %119 = arith.mulf %110, %7 : vector<2x32xf32>
    %120 = arith.mulf %104, %112 : vector<2x32xf32>
    %121 = arith.addf %119, %120 : vector<2x32xf32>
    %122 = math.tanh %121 : vector<2x32xf32>
    %123 = arith.mulf %118, %122 : vector<2x32xf32>
    %c0_58 = arith.constant 0 : index
    %c0_59 = arith.constant 0 : index
    %c0_60 = arith.constant 0 : index
    %124 = vector.load %arg14[%c0_58, %c0_59, %c0_60] : memref<2x2x32xf32, #tpu.memory_space<vmem>>, vector<1x2x32xf32>
    %125 = vector.shape_cast %124 : vector<1x2x32xf32> to vector<2x32xf32>
    %126 = vector.shape_cast %52 : vector<2x32xf32> to vector<1x2x32xf32>
    tpu.vector_store %arg14[%c0_58, %c0_59, %c0_60], %126 {strides = array<i32>} : memref<2x2x32xf32, #tpu.memory_space<vmem>>, vector<1x2x32xf32>,
    %c1_61 = arith.constant 1 : index
    %c0_62 = arith.constant 0 : index
    %c0_63 = arith.constant 0 : index
    %127 = vector.load %arg14[%c1_61, %c0_62, %c0_63] : memref<2x2x32xf32, #tpu.memory_space<vmem>>, vector<1x2x32xf32>
    %128 = vector.shape_cast %127 : vector<1x2x32xf32> to vector<2x32xf32>
    %129 = vector.shape_cast %123 : vector<2x32xf32> to vector<1x2x32xf32>
    tpu.vector_store %arg14[%c1_61, %c0_62, %c0_63], %129 {strides = array<i32>} : memref<2x2x32xf32, #tpu.memory_space<vmem>>, vector<1x2x32xf32>,
    %c0_64 = arith.constant 0 : index
    %c0_65 = arith.constant 0 : index
    %c0_66 = arith.constant 0 : index
    %130 = vector.load %arg15[%c0_64, %c0_65, %c0_66] : memref<2x2x32xf32, #tpu.memory_space<vmem>>, vector<1x2x32xf32>
    %131 = vector.shape_cast %130 : vector<1x2x32xf32> to vector<2x32xf32>
    %132 = vector.shape_cast %50 : vector<2x32xf32> to vector<1x2x32xf32>
    tpu.vector_store %arg15[%c0_64, %c0_65, %c0_66], %132 {strides = array<i32>} : memref<2x2x32xf32, #tpu.memory_space<vmem>>, vector<1x2x32xf32>,
    %c1_67 = arith.constant 1 : index
    %c0_68 = arith.constant 0 : index
    %c0_69 = arith.constant 0 : index
    %133 = vector.load %arg15[%c1_67, %c0_68, %c0_69] : memref<2x2x32xf32, #tpu.memory_space<vmem>>, vector<1x2x32xf32>
    %134 = vector.shape_cast %133 : vector<1x2x32xf32> to vector<2x32xf32>
    %135 = vector.shape_cast %121 : vector<2x32xf32> to vector<1x2x32xf32>
    tpu.vector_store %arg15[%c1_67, %c0_68, %c0_69], %135 {strides = array<i32>} : memref<2x2x32xf32, #tpu.memory_space<vmem>>, vector<1x2x32xf32>,
    return
  }
  func.func @transform_0(%arg0: i32) -> (i32, i32) {
    %c0_i32 = arith.constant 0 : i32
    %c0_i32_0 = arith.constant 0 : i32
    return %arg0, %c0_i32 : i32, i32
  }
  func.func @transform_1(%arg0: i32) -> (i32, i32) {
    %c0_i32 = arith.constant 0 : i32
    %c0_i32_0 = arith.constant 0 : i32
    return %arg0, %c0_i32 : i32, i32
  }
  func.func @transform_2(%arg0: i32) -> (i32, i32, i32) {
    %c0_i32 = arith.constant 0 : i32
    %c0_i32_0 = arith.constant 0 : i32
    %c0_i32_1 = arith.constant 0 : i32
    return %arg0, %c0_i32, %c0_i32_0 : i32, i32, i32
  }
  func.func @transform_3(%arg0: i32) -> (i32, i32, i32) {
    %c0_i32 = arith.constant 0 : i32
    %c0_i32_0 = arith.constant 0 : i32
    %c0_i32_1 = arith.constant 0 : i32
    return %arg0, %c0_i32, %c0_i32_0 : i32, i32, i32
  }
  func.func @transform_4(%arg0: i32) -> (i32, i32, i32) {
    %c0_i32 = arith.constant 0 : i32
    %c0_i32_0 = arith.constant 0 : i32
    %c0_i32_1 = arith.constant 0 : i32
    return %c0_i32, %arg0, %c0_i32_0 : i32, i32, i32
  }
  func.func @transform_5(%arg0: i32) -> (i32, i32, i32) {
    %c0_i32 = arith.constant 0 : i32
    %c0_i32_0 = arith.constant 0 : i32
    %c0_i32_1 = arith.constant 0 : i32
    return %c0_i32, %arg0, %c0_i32_0 : i32, i32, i32
  }
  func.func @transform_6(%arg0: i32) -> (i32, i32) {
    %c0_i32 = arith.constant 0 : i32
    %c0_i32_0 = arith.constant 0 : i32
    %c0_i32_1 = arith.constant 0 : i32
    return %c0_i32, %c0_i32_0 : i32, i32
  }
  func.func @transform_7(%arg0: i32) -> (i32, i32) {
    %c0_i32 = arith.constant 0 : i32
    %c0_i32_0 = arith.constant 0 : i32
    %c0_i32_1 = arith.constant 0 : i32
    return %c0_i32, %c0_i32_0 : i32, i32
  }
  func.func @transform_8(%arg0: i32) -> (i32, i32) {
    %c0_i32 = arith.constant 0 : i32
    %c0_i32_0 = arith.constant 0 : i32
    %c0_i32_1 = arith.constant 0 : i32
    return %c0_i32, %c0_i32_0 : i32, i32
  }
  func.func @transform_9(%arg0: i32) -> (i32, i32) {
    %c0_i32 = arith.constant 0 : i32
    %c0_i32_0 = arith.constant 0 : i32
    %c0_i32_1 = arith.constant 0 : i32
    return %c0_i32, %c0_i32_0 : i32, i32
  }
  func.func @transform_10(%arg0: i32) -> (i32, i32) {
    %c0_i32 = arith.constant 0 : i32
    %c0_i32_0 = arith.constant 0 : i32
    %c0_i32_1 = arith.constant 0 : i32
    return %c0_i32, %c0_i32_0 : i32, i32
  }
  func.func @transform_11(%arg0: i32) -> (i32, i32) {
    %c0_i32 = arith.constant 0 : i32
    %c0_i32_0 = arith.constant 0 : i32
    %c0_i32_1 = arith.constant 0 : i32
    return %c0_i32, %c0_i32_0 : i32, i32
  }
  func.func @transform_12(%arg0: i32) -> (i32, i32) {
    %c0_i32 = arith.constant 0 : i32
    %c0_i32_0 = arith.constant 0 : i32
    %c0_i32_1 = arith.constant 0 : i32
    return %c0_i32, %c0_i32_0 : i32, i32
  }
  func.func @transform_13(%arg0: i32) -> (i32, i32, i32) {
    %c0_i32 = arith.constant 0 : i32
    %c0_i32_0 = arith.constant 0 : i32
    %c0_i32_1 = arith.constant 0 : i32
    return %c0_i32, %arg0, %c0_i32_0 : i32, i32, i32
  }
  func.func @transform_14(%arg0: i32) -> (i32, i32, i32) {
    %c0_i32 = arith.constant 0 : i32
    %c0_i32_0 = arith.constant 0 : i32
    %c0_i32_1 = arith.constant 0 : i32
    return %c0_i32, %arg0, %c0_i32_0 : i32, i32, i32
  }
}

module attributes {stable_mosaic.version = 11 : i64} {
  func.func @_topdown_kernel(%arg0: i32, %arg1: memref<2x32xf32, #tpu.memory_space<vmem>>, %arg2: memref<2x32xf32, #tpu.memory_space<vmem>>, %arg3: memref<2x8x32xbf16, #tpu.memory_space<vmem>>, %arg4: memref<2x8x32xbf16, #tpu.memory_space<vmem>>, %arg5: memref<2x2x32xf32, #tpu.memory_space<vmem>>, %arg6: memref<2x2x32xf32, #tpu.memory_space<vmem>>, %arg7: memref<128x128xbf16, #tpu.memory_space<vmem>>, %arg8: memref<1x128xf32, #tpu.memory_space<vmem>>, %arg9: memref<32x32xbf16, #tpu.memory_space<vmem>>, %arg10: memref<1x32xf32, #tpu.memory_space<vmem>>, %arg11: memref<1x32xf32, #tpu.memory_space<vmem>>, %arg12: memref<96x128xbf16, #tpu.memory_space<vmem>>, %arg13: memref<1x128xf32, #tpu.memory_space<vmem>>, %arg14: memref<2x2x32xf32, #tpu.memory_space<vmem>>, %arg15: memref<2x2x32xf32, #tpu.memory_space<vmem>>) attributes {dimension_semantics = [#tpu.dimension_semantics<parallel>], iteration_bounds = array<i64: 1>, scalar_prefetch = 0 : i64, scratch_operands = 0 : i64, tpu.core_type = #tpu.core_type<tc>, window_params = [{transform_indices = @transform_0, window_bounds = array<i64: 2, 32>}, {transform_indices = @transform_1, window_bounds = array<i64: 2, 32>}, {transform_indices = @transform_2, window_bounds = array<i64: 2, 8, 32>}, {transform_indices = @transform_3, window_bounds = array<i64: 2, 8, 32>}, {transform_indices = @transform_4, window_bounds = array<i64: 2, 2, 32>}, {transform_indices = @transform_5, window_bounds = array<i64: 2, 2, 32>}, {pipeline_mode = #tpu.pipeline_mode<synchronous>, transform_indices = @transform_6, window_bounds = array<i64: 128, 128>}, {pipeline_mode = #tpu.pipeline_mode<synchronous>, transform_indices = @transform_7, window_bounds = array<i64: 1, 128>}, {pipeline_mode = #tpu.pipeline_mode<synchronous>, transform_indices = @transform_8, window_bounds = array<i64: 32, 32>}, {pipeline_mode = #tpu.pipeline_mode<synchronous>, transform_indices = @transform_9, window_bounds = array<i64: 1, 32>}, {pipeline_mode = #tpu.pipeline_mode<synchronous>, transform_indices = @transform_10, window_bounds = array<i64: 1, 32>}, {pipeline_mode = #tpu.pipeline_mode<synchronous>, transform_indices = @transform_11, window_bounds = array<i64: 96, 128>}, {pipeline_mode = #tpu.pipeline_mode<synchronous>, transform_indices = @transform_12, window_bounds = array<i64: 1, 128>}, {transform_indices = @transform_13, window_bounds = array<i64: 2, 2, 32>}, {transform_indices = @transform_14, window_bounds = array<i64: 2, 2, 32>}]} {
    %c0 = arith.constant 0 : index
    %c0_0 = arith.constant 0 : index
    %c0_1 = arith.constant 0 : index
    %0 = vector.load %arg5[%c0, %c0_0, %c0_1] : memref<2x2x32xf32, #tpu.memory_space<vmem>>, vector<1x2x32xf32>
    %1 = vector.shape_cast %0 : vector<1x2x32xf32> to vector<2x32xf32>
    %c1 = arith.constant 1 : index
    %c0_2 = arith.constant 0 : index
    %c0_3 = arith.constant 0 : index
    %2 = vector.load %arg5[%c1, %c0_2, %c0_3] : memref<2x2x32xf32, #tpu.memory_space<vmem>>, vector<1x2x32xf32>
    %3 = vector.shape_cast %2 : vector<1x2x32xf32> to vector<2x32xf32>
    %c0_4 = arith.constant 0 : index
    %c0_5 = arith.constant 0 : index
    %c0_6 = arith.constant 0 : index
    %4 = vector.load %arg6[%c0_4, %c0_5, %c0_6] : memref<2x2x32xf32, #tpu.memory_space<vmem>>, vector<1x2x32xf32>
    %5 = vector.shape_cast %4 : vector<1x2x32xf32> to vector<2x32xf32>
    %c1_7 = arith.constant 1 : index
    %c0_8 = arith.constant 0 : index
    %c0_9 = arith.constant 0 : index
    %6 = vector.load %arg6[%c1_7, %c0_8, %c0_9] : memref<2x2x32xf32, #tpu.memory_space<vmem>>, vector<1x2x32xf32>
    %7 = vector.shape_cast %6 : vector<1x2x32xf32> to vector<2x32xf32>
    %8 = arith.truncf %3 : vector<2x32xf32> to vector<2x32xbf16>
    %c0_10 = arith.constant 0 : index
    %c0_11 = arith.constant 0 : index
    %9 = vector.load %arg7[%c0_10, %c0_11] : memref<128x128xbf16, #tpu.memory_space<vmem>>, vector<32x128xbf16>
    %cst = arith.constant dense<0.000000e+00> : vector<2x128xf32>
    %10 = tpu.matmul %8, %9, %cst {dimension_numbers = #tpu.dot_dimension_numbers<[1], [0], [0], [1], [0, 0, 1, 1], [], []>} : vector<2x32xbf16>, vector<32x128xbf16>, vector<2x128xf32> -> vector<2x128xf32>
    %c0_12 = arith.constant 0 : index
    %c0_13 = arith.constant 0 : index
    %11 = vector.load %arg2[%c0_12, %c0_13] : memref<2x32xf32, #tpu.memory_space<vmem>>, vector<2x32xf32>
    %12 = arith.truncf %11 : vector<2x32xf32> to vector<2x32xbf16>
    %c32 = arith.constant 32 : index
    %c0_14 = arith.constant 0 : index
    %13 = vector.load %arg7[%c32, %c0_14] : memref<128x128xbf16, #tpu.memory_space<vmem>>, vector<32x128xbf16>
    %cst_15 = arith.constant dense<0.000000e+00> : vector<2x128xf32>
    %14 = tpu.matmul %12, %13, %cst_15 {dimension_numbers = #tpu.dot_dimension_numbers<[1], [0], [0], [1], [0, 0, 1, 1], [], []>} : vector<2x32xbf16>, vector<32x128xbf16>, vector<2x128xf32> -> vector<2x128xf32>
    %15 = arith.addf %10, %14 : vector<2x128xf32>
    %c0_16 = arith.constant 0 : index
    %c0_17 = arith.constant 0 : index
    %16 = vector.load %arg1[%c0_16, %c0_17] : memref<2x32xf32, #tpu.memory_space<vmem>>, vector<2x32xf32>
    %17 = arith.truncf %16 : vector<2x32xf32> to vector<2x32xbf16>
    %c64 = arith.constant 64 : index
    %c0_18 = arith.constant 0 : index
    %18 = vector.load %arg7[%c64, %c0_18] : memref<128x128xbf16, #tpu.memory_space<vmem>>, vector<32x128xbf16>
    %cst_19 = arith.constant dense<0.000000e+00> : vector<2x128xf32>
    %19 = tpu.matmul %17, %18, %cst_19 {dimension_numbers = #tpu.dot_dimension_numbers<[1], [0], [0], [1], [0, 0, 1, 1], [], []>} : vector<2x32xbf16>, vector<32x128xbf16>, vector<2x128xf32> -> vector<2x128xf32>
    %20 = arith.addf %15, %19 : vector<2x128xf32>
    %21 = arith.truncf %1 : vector<2x32xf32> to vector<2x32xbf16>
    %c96 = arith.constant 96 : index
    %c0_20 = arith.constant 0 : index
    %22 = vector.load %arg7[%c96, %c0_20] : memref<128x128xbf16, #tpu.memory_space<vmem>>, vector<32x128xbf16>
    %cst_21 = arith.constant dense<0.000000e+00> : vector<2x128xf32>
    %23 = tpu.matmul %21, %22, %cst_21 {dimension_numbers = #tpu.dot_dimension_numbers<[1], [0], [0], [1], [0, 0, 1, 1], [], []>} : vector<2x32xbf16>, vector<32x128xbf16>, vector<2x128xf32> -> vector<2x128xf32>
    %24 = arith.addf %20, %23 : vector<2x128xf32>
    %c0_22 = arith.constant 0 : index
    %c0_23 = arith.constant 0 : index
    %25 = vector.load %arg8[%c0_22, %c0_23] : memref<1x128xf32, #tpu.memory_space<vmem>>, vector<1x128xf32>
    %26 = vector.broadcast %25 : vector<1x128xf32> to vector<2x128xf32>
    %27 = arith.addf %24, %26 : vector<2x128xf32>
    %28 = vector.extract_strided_slice %27 {offsets = [0, 0], sizes = [2, 32], strides = [1, 1]} : vector<2x128xf32> to vector<2x32xf32>
    %29 = arith.negf %28 : vector<2x32xf32>
    %30 = math.exp %29 : vector<2x32xf32>
    %cst_24 = arith.constant 1.000000e+00 : f32
    %31 = vector.broadcast %cst_24 : f32 to vector<2x32xf32>
    %32 = arith.addf %31, %30 : vector<2x32xf32>
    %33 = arith.divf %31, %32 : vector<2x32xf32>
    %34 = vector.extract_strided_slice %27 {offsets = [0, 32], sizes = [2, 32], strides = [1, 1]} : vector<2x128xf32> to vector<2x32xf32>
    %35 = arith.negf %34 : vector<2x32xf32>
    %36 = math.exp %35 : vector<2x32xf32>
    %cst_25 = arith.constant 1.000000e+00 : f32
    %37 = vector.broadcast %cst_25 : f32 to vector<2x32xf32>
    %38 = arith.addf %37, %36 : vector<2x32xf32>
    %39 = arith.divf %37, %38 : vector<2x32xf32>
    %40 = vector.extract_strided_slice %27 {offsets = [0, 64], sizes = [2, 32], strides = [1, 1]} : vector<2x128xf32> to vector<2x32xf32>
    %41 = math.tanh %40 : vector<2x32xf32>
    %42 = vector.extract_strided_slice %27 {offsets = [0, 96], sizes = [2, 32], strides = [1, 1]} : vector<2x128xf32> to vector<2x32xf32>
    %43 = arith.negf %42 : vector<2x32xf32>
    %44 = math.exp %43 : vector<2x32xf32>
    %cst_26 = arith.constant 1.000000e+00 : f32
    %45 = vector.broadcast %cst_26 : f32 to vector<2x32xf32>
    %46 = arith.addf %45, %44 : vector<2x32xf32>
    %47 = arith.divf %45, %46 : vector<2x32xf32>
    %48 = arith.mulf %39, %5 : vector<2x32xf32>
    %49 = arith.mulf %33, %41 : vector<2x32xf32>
    %50 = arith.addf %48, %49 : vector<2x32xf32>
    %51 = math.tanh %50 : vector<2x32xf32>
    %52 = arith.mulf %47, %51 : vector<2x32xf32>
    %53 = arith.truncf %52 : vector<2x32xf32> to vector<2x32xbf16>
    %c0_27 = arith.constant 0 : index
    %c0_28 = arith.constant 0 : index
    %54 = vector.load %arg9[%c0_27, %c0_28] : memref<32x32xbf16, #tpu.memory_space<vmem>>, vector<32x32xbf16>
    %cst_29 = arith.constant dense<0.000000e+00> : vector<2x32xf32>
    %55 = tpu.matmul %53, %54, %cst_29 {dimension_numbers = #tpu.dot_dimension_numbers<[1], [0], [0], [1], [0, 0, 1, 1], [], []>} : vector<2x32xbf16>, vector<32x32xbf16>, vector<2x32xf32> -> vector<2x32xf32>
    %c0_30 = arith.constant 0 : index
    %c0_31 = arith.constant 0 : index
    %56 = vector.load %arg10[%c0_30, %c0_31] : memref<1x32xf32, #tpu.memory_space<vmem>>, vector<1x32xf32>
    %57 = vector.broadcast %56 : vector<1x32xf32> to vector<2x32xf32>
    %58 = arith.addf %55, %57 : vector<2x32xf32>
    %c0_32 = arith.constant 0 : index
    %c0_33 = arith.constant 0 : index
    %c0_34 = arith.constant 0 : index
    %59 = vector.load %arg4[%c0_32, %c0_33, %c0_34] : memref<2x8x32xbf16, #tpu.memory_space<vmem>>, vector<2x8x32xbf16>
    %60 = arith.extf %59 : vector<2x8x32xbf16> to vector<2x8x32xf32>
    %61 = vector.shape_cast %58 : vector<2x32xf32> to vector<2x1x32xf32>
    %62 = vector.broadcast %61 : vector<2x1x32xf32> to vector<2x8x32xf32>
    %63 = arith.addf %60, %62 : vector<2x8x32xf32>
    %64 = math.tanh %63 : vector<2x8x32xf32>
    %c0_35 = arith.constant 0 : index
    %c0_36 = arith.constant 0 : index
    %65 = vector.load %arg11[%c0_35, %c0_36] : memref<1x32xf32, #tpu.memory_space<vmem>>, vector<1x32xf32>
    %66 = vector.shape_cast %65 : vector<1x32xf32> to vector<1x1x32xf32>
    %67 = vector.broadcast %66 : vector<1x1x32xf32> to vector<2x8x32xf32>
    %68 = arith.mulf %64, %67 : vector<2x8x32xf32>
    %cst_37 = arith.constant dense<0.000000e+00> : vector<2x8xf32>
    %69 = vector.multi_reduction <add>, %68, %cst_37 [2] : vector<2x8x32xf32> to vector<2x8xf32>
    %cst_38 = arith.constant dense<0xFF800000> : vector<2xf32>
    %70 = vector.multi_reduction <maximumf>, %69, %cst_38 [1] : vector<2x8xf32> to vector<2xf32>
    %71 = vector.shape_cast %70 : vector<2xf32> to vector<2x1xf32>
    %72 = vector.broadcast %71 : vector<2x1xf32> to vector<2x8xf32>
    %73 = arith.subf %69, %72 : vector<2x8xf32>
    %74 = math.exp %73 : vector<2x8xf32>
    %cst_39 = arith.constant dense<0.000000e+00> : vector<2xf32>
    %75 = vector.multi_reduction <add>, %74, %cst_39 [1] : vector<2x8xf32> to vector<2xf32>
    %76 = vector.shape_cast %75 : vector<2xf32> to vector<2x1xf32>
    %77 = vector.broadcast %76 : vector<2x1xf32> to vector<2x8xf32>
    %78 = arith.divf %74, %77 : vector<2x8xf32>
    %79 = vector.shape_cast %78 : vector<2x8xf32> to vector<2x8x1xf32>
    %c0_40 = arith.constant 0 : index
    %c0_41 = arith.constant 0 : index
    %c0_42 = arith.constant 0 : index
    %80 = vector.load %arg3[%c0_40, %c0_41, %c0_42] : memref<2x8x32xbf16, #tpu.memory_space<vmem>>, vector<2x8x32xbf16>
    %81 = arith.extf %80 : vector<2x8x32xbf16> to vector<2x8x32xf32>
    %82 = vector.broadcast %79 : vector<2x8x1xf32> to vector<2x8x32xf32>
    %83 = arith.mulf %82, %81 : vector<2x8x32xf32>
    %cst_43 = arith.constant dense<0.000000e+00> : vector<2x32xf32>
    %84 = vector.multi_reduction <add>, %83, %cst_43 [1] : vector<2x8x32xf32> to vector<2x32xf32>
    %85 = arith.truncf %84 : vector<2x32xf32> to vector<2x32xbf16>
    %c0_44 = arith.constant 0 : index
    %c0_45 = arith.constant 0 : index
    %86 = vector.load %arg12[%c0_44, %c0_45] : memref<96x128xbf16, #tpu.memory_space<vmem>>, vector<32x128xbf16>
    %cst_46 = arith.constant dense<0.000000e+00> : vector<2x128xf32>
    %87 = tpu.matmul %85, %86, %cst_46 {dimension_numbers = #tpu.dot_dimension_numbers<[1], [0], [0], [1], [0, 0, 1, 1], [], []>} : vector<2x32xbf16>, vector<32x128xbf16>, vector<2x128xf32> -> vector<2x128xf32>
    %88 = arith.truncf %52 : vector<2x32xf32> to vector<2x32xbf16>
    %c32_47 = arith.constant 32 : index
    %c0_48 = arith.constant 0 : index
    %89 = vector.load %arg12[%c32_47, %c0_48] : memref<96x128xbf16, #tpu.memory_space<vmem>>, vector<32x128xbf16>
    %cst_49 = arith.constant dense<0.000000e+00> : vector<2x128xf32>
    %90 = tpu.matmul %88, %89, %cst_49 {dimension_numbers = #tpu.dot_dimension_numbers<[1], [0], [0], [1], [0, 0, 1, 1], [], []>} : vector<2x32xbf16>, vector<32x128xbf16>, vector<2x128xf32> -> vector<2x128xf32>
    %91 = arith.addf %87, %90 : vector<2x128xf32>
    %92 = arith.truncf %3 : vector<2x32xf32> to vector<2x32xbf16>
    %c64_50 = arith.constant 64 : index
    %c0_51 = arith.constant 0 : index
    %93 = vector.load %arg12[%c64_50, %c0_51] : memref<96x128xbf16, #tpu.memory_space<vmem>>, vector<32x128xbf16>
    %cst_52 = arith.constant dense<0.000000e+00> : vector<2x128xf32>
    %94 = tpu.matmul %92, %93, %cst_52 {dimension_numbers = #tpu.dot_dimension_numbers<[1], [0], [0], [1], [0, 0, 1, 1], [], []>} : vector<2x32xbf16>, vector<32x128xbf16>, vector<2x128xf32> -> vector<2x128xf32>
    %95 = arith.addf %91, %94 : vector<2x128xf32>
    %c0_53 = arith.constant 0 : index
    %c0_54 = arith.constant 0 : index
    %96 = vector.load %arg13[%c0_53, %c0_54] : memref<1x128xf32, #tpu.memory_space<vmem>>, vector<1x128xf32>
    %97 = vector.broadcast %96 : vector<1x128xf32> to vector<2x128xf32>
    %98 = arith.addf %95, %97 : vector<2x128xf32>
    %99 = vector.extract_strided_slice %98 {offsets = [0, 0], sizes = [2, 32], strides = [1, 1]} : vector<2x128xf32> to vector<2x32xf32>
    %100 = arith.negf %99 : vector<2x32xf32>
    %101 = math.exp %100 : vector<2x32xf32>
    %cst_55 = arith.constant 1.000000e+00 : f32
    %102 = vector.broadcast %cst_55 : f32 to vector<2x32xf32>
    %103 = arith.addf %102, %101 : vector<2x32xf32>
    %104 = arith.divf %102, %103 : vector<2x32xf32>
    %105 = vector.extract_strided_slice %98 {offsets = [0, 32], sizes = [2, 32], strides = [1, 1]} : vector<2x128xf32> to vector<2x32xf32>
    %106 = arith.negf %105 : vector<2x32xf32>
    %107 = math.exp %106 : vector<2x32xf32>
    %cst_56 = arith.constant 1.000000e+00 : f32
    %108 = vector.broadcast %cst_56 : f32 to vector<2x32xf32>
    %109 = arith.addf %108, %107 : vector<2x32xf32>
    %110 = arith.divf %108, %109 : vector<2x32xf32>
    %111 = vector.extract_strided_slice %98 {offsets = [0, 64], sizes = [2, 32], strides = [1, 1]} : vector<2x128xf32> to vector<2x32xf32>
    %112 = math.tanh %111 : vector<2x32xf32>
    %113 = vector.extract_strided_slice %98 {offsets = [0, 96], sizes = [2, 32], strides = [1, 1]} : vector<2x128xf32> to vector<2x32xf32>
    %114 = arith.negf %113 : vector<2x32xf32>
    %115 = math.exp %114 : vector<2x32xf32>
    %cst_57 = arith.constant 1.000000e+00 : f32
    %116 = vector.broadcast %cst_57 : f32 to vector<2x32xf32>
    %117 = arith.addf %116, %115 : vector<2x32xf32>
    %118 = arith.divf %116, %117 : vector<2x32xf32>
    %119 = arith.mulf %110, %7 : vector<2x32xf32>
    %120 = arith.mulf %104, %112 : vector<2x32xf32>
    %121 = arith.addf %119, %120 : vector<2x32xf32>
    %122 = math.tanh %121 : vector<2x32xf32>
    %123 = arith.mulf %118, %122 : vector<2x32xf32>
    %c0_58 = arith.constant 0 : index
    %c0_59 = arith.constant 0 : index
    %c0_60 = arith.constant 0 : index
    %124 = vector.load %arg14[%c0_58, %c0_59, %c0_60] : memref<2x2x32xf32, #tpu.memory_space<vmem>>, vector<1x2x32xf32>
    %125 = vector.shape_cast %124 : vector<1x2x32xf32> to vector<2x32xf32>
    %126 = vector.shape_cast %52 : vector<2x32xf32> to vector<1x2x32xf32>
    tpu.vector_store %arg14[%c0_58, %c0_59, %c0_60], %126 {strides = array<i32>} : memref<2x2x32xf32, #tpu.memory_space<vmem>>, vector<1x2x32xf32>,
    %c1_61 = arith.constant 1 : index
    %c0_62 = arith.constant 0 : index
    %c0_63 = arith.constant 0 : index
    %127 = vector.load %arg14[%c1_61, %c0_62, %c0_63] : memref<2x2x32xf32, #tpu.memory_space<vmem>>, vector<1x2x32xf32>
    %128 = vector.shape_cast %127 : vector<1x2x32xf32> to vector<2x32xf32>
    %129 = vector.shape_cast %123 : vector<2x32xf32> to vector<1x2x32xf32>
    tpu.vector_store %arg14[%c1_61, %c0_62, %c0_63], %129 {strides = array<i32>} : memref<2x2x32xf32, #tpu.memory_space<vmem>>, vector<1x2x32xf32>,
    %c0_64 = arith.constant 0 : index
    %c0_65 = arith.constant 0 : index
    %c0_66 = arith.constant 0 : index
    %130 = vector.load %arg15[%c0_64, %c0_65, %c0_66] : memref<2x2x32xf32, #tpu.memory_space<vmem>>, vector<1x2x32xf32>
    %131 = vector.shape_cast %130 : vector<1x2x32xf32> to vector<2x32xf32>
    %132 = vector.shape_cast %50 : vector<2x32xf32> to vector<1x2x32xf32>
    tpu.vector_store %arg15[%c0_64, %c0_65, %c0_66], %132 {strides = array<i32>} : memref<2x2x32xf32, #tpu.memory_space<vmem>>, vector<1x2x32xf32>,
    %c1_67 = arith.constant 1 : index
    %c0_68 = arith.constant 0 : index
    %c0_69 = arith.constant 0 : index
    %133 = vector.load %arg15[%c1_67, %c0_68, %c0_69] : memref<2x2x32xf32, #tpu.memory_space<vmem>>, vector<1x2x32xf32>
    %134 = vector.shape_cast %133 : vector<1x2x32xf32> to vector<2x32xf32>
    %135 = vector.shape_cast %121 : vector<2x32xf32> to vector<1x2x32xf32>
    tpu.vector_store %arg15[%c1_67, %c0_68, %c0_69], %135 {strides = array<i32>} : memref<2x2x32xf32, #tpu.memory_space<vmem>>, vector<1x2x32xf32>,
    return
  }
  func.func @transform_0(%arg0: i32) -> (i32, i32) {
    %c0_i32 = arith.constant 0 : i32
    %c0_i32_0 = arith.constant 0 : i32
    return %arg0, %c0_i32 : i32, i32
  }
  func.func @transform_1(%arg0: i32) -> (i32, i32) {
    %c0_i32 = arith.constant 0 : i32
    %c0_i32_0 = arith.constant 0 : i32
    return %arg0, %c0_i32 : i32, i32
  }
  func.func @transform_2(%arg0: i32) -> (i32, i32, i32) {
    %c0_i32 = arith.constant 0 : i32
    %c0_i32_0 = arith.constant 0 : i32
    %c0_i32_1 = arith.constant 0 : i32
    return %arg0, %c0_i32, %c0_i32_0 : i32, i32, i32
  }
  func.func @transform_3(%arg0: i32) -> (i32, i32, i32) {
    %c0_i32 = arith.constant 0 : i32
    %c0_i32_0 = arith.constant 0 : i32
    %c0_i32_1 = arith.constant 0 : i32
    return %arg0, %c0_i32, %c0_i32_0 : i32, i32, i32
  }
  func.func @transform_4(%arg0: i32) -> (i32, i32, i32) {
    %c0_i32 = arith.constant 0 : i32
    %c0_i32_0 = arith.constant 0 : i32
    %c0_i32_1 = arith.constant 0 : i32
    return %c0_i32, %arg0, %c0_i32_0 : i32, i32, i32
  }
  func.func @transform_5(%arg0: i32) -> (i32, i32, i32) {
    %c0_i32 = arith.constant 0 : i32
    %c0_i32_0 = arith.constant 0 : i32
    %c0_i32_1 = arith.constant 0 : i32
    return %c0_i32, %arg0, %c0_i32_0 : i32, i32, i32
  }
  func.func @transform_6(%arg0: i32) -> (i32, i32) {
    %c0_i32 = arith.constant 0 : i32
    %c0_i32_0 = arith.constant 0 : i32
    %c0_i32_1 = arith.constant 0 : i32
    return %c0_i32, %c0_i32_0 : i32, i32
  }
  func.func @transform_7(%arg0: i32) -> (i32, i32) {
    %c0_i32 = arith.constant 0 : i32
    %c0_i32_0 = arith.constant 0 : i32
    %c0_i32_1 = arith.constant 0 : i32
    return %c0_i32, %c0_i32_0 : i32, i32
  }
  func.func @transform_8(%arg0: i32) -> (i32, i32) {
    %c0_i32 = arith.constant 0 : i32
    %c0_i32_0 = arith.constant 0 : i32
    %c0_i32_1 = arith.constant 0 : i32
    return %c0_i32, %c0_i32_0 : i32, i32
  }
  func.func @transform_9(%arg0: i32) -> (i32, i32) {
    %c0_i32 = arith.constant 0 : i32
    %c0_i32_0 = arith.constant 0 : i32
    %c0_i32_1 = arith.constant 0 : i32
    return %c0_i32, %c0_i32_0 : i32, i32
  }
  func.func @transform_10(%arg0: i32) -> (i32, i32) {
    %c0_i32 = arith.constant 0 : i32
    %c0_i32_0 = arith.constant 0 : i32
    %c0_i32_1 = arith.constant 0 : i32
    return %c0_i32, %c0_i32_0 : i32, i32
  }
  func.func @transform_11(%arg0: i32) -> (i32, i32) {
    %c0_i32 = arith.constant 0 : i32
    %c0_i32_0 = arith.constant 0 : i32
    %c0_i32_1 = arith.constant 0 : i32
    return %c0_i32, %c0_i32_0 : i32, i32
  }
  func.func @transform_12(%arg0: i32) -> (i32, i32) {
    %c0_i32 = arith.constant 0 : i32
    %c0_i32_0 = arith.constant 0 : i32
    %c0_i32_1 = arith.constant 0 : i32
    return %c0_i32, %c0_i32_0 : i32, i32
  }
  func.func @transform_13(%arg0: i32) -> (i32, i32, i32) {
    %c0_i32 = arith.constant 0 : i32
    %c0_i32_0 = arith.constant 0 : i32
    %c0_i32_1 = arith.constant 0 : i32
    return %c0_i32, %arg0, %c0_i32_0 : i32, i32, i32
  }
  func.func @transform_14(%arg0: i32) -> (i32, i32, i32) {
    %c0_i32 = arith.constant 0 : i32
    %c0_i32_0 = arith.constant 0 : i32
    %c0_i32_1 = arith.constant 0 : i32
    return %c0_i32, %arg0, %c0_i32_0 : i32, i32, i32
  }
}

</mosaic_0001>

<bundles_post_ra>
// kernel: topdown_core.1
= control target key start
LH: loop header
LB: loop body
LE: loop exit
PB: predicated region body
PF: predicated region fallthrough
CT: control target
= control target key end

     0   :  { %20 = vsyncpa [#allocation3], 0  ;;  %s1971_s0 = inlined_call_operand.hbm [shape: f32[2,32], index: 0, kind: input, shape index: {}]   ;;  %s1972_s1 = inlined_call_operand.hbm [shape: f32[2,32], index: 1, kind: input, shape index: {}]   ;;  %s1973_s2 = inlined_call_operand.hbm [shape: bf16[2,8,32], index: 2, kind: input, shape index: {}]   ;;  %s1974_s3 = inlined_call_operand.hbm [shape: bf16[2,8,32], index: 3, kind: input, shape index: {}]   ;;  %s1975_s4 = inlined_call_operand.hbm [shape: f32[2,2,32], index: 4, kind: input, shape index: {}, may-alias: {4,13}]   ;;  %s1976_s5 = inlined_call_operand.hbm [shape: f32[2,2,32], index: 5, kind: input, shape index: {}, may-alias: {5,14}]   ;;  %s1977_s6 = inlined_call_operand.hbm [shape: bf16[128,128], index: 6, kind: input, shape index: {}]   ;;  %s1978_s7 = inlined_call_operand.hbm [shape: f32[1,128], index: 7, kind: input, shape index: {}]   ;;  %s1979_s8 = inlined_call_operand.hbm [shape: bf16[32,32], index: 8, kind: input, shape index: {}]   ;;  %s1980_s9 = inlined_call_operand.hbm [shape: f32[1,32], index: 9, kind: input, shape index: {}]   ;;  %s1981_s10 = inlined_call_operand.hbm [shape: f32[1,32], index: 10, kind: input, shape index: {}]   ;;  %s1982_s11 = inlined_call_operand.hbm [shape: bf16[96,128], index: 11, kind: input, shape index: {}]   ;;  %s1983_s12 = inlined_call_operand.hbm [shape: f32[1,128], index: 12, kind: input, shape index: {}]   ;;  %s1984_s13 = inlined_call_operand.hbm [shape: f32[2,2,32], index: 13, kind: output, shape index: {0}, may-alias: {4,13}]   ;;  %s1985_s14 = inlined_call_operand.hbm [shape: f32[2,2,32], index: 14, kind: output, shape index: {1}, may-alias: {5,14}]  }
   0x1   :  { %21 = vsyncpa [#allocation6], 0 }
   0x2   :  { %22 = vsyncpa [#allocation9], 0 }
   0x3   :  { %23 = vsyncpa [#allocation12], 0 }
   0x4   :  { %24 = vsyncpa [#allocation15], 0 }
   0x5   :  { %25 = vsyncpa [#allocation18], 0 }
   0x6   :  { %26 = vsyncpa [#allocation21], 0 }
   0x7   :  { %27 = vsyncpa [#allocation4], 0 }
   0x8   :  { %28 = vsyncpa [#allocation25], 0  ;;  %s1550_s29 = smov [#allocation5]   ;;  %s1202_s17 = scalar_lea.hbm %s1972_s1, 32 }
   0x9   :  { %s45_s30 = sshll.u32 %s1550_s29, 4  ;;  %p1203_p0 = scmp.ne.s32.totalorder %s1972_s1, %s1202_s17  ;;  %s46_s30 = int_to_ptr.vmem [resolvable:$true] %s45_s30 }
   0xa   :  { %p1206_p1 = scmp.lt.u32.totalorder %s1202_s17, %s1972_s1 }
   0xc   :  { %p1208_p2 = pnand %p1206_p1, %p1203_p0 }
   0xe   :  { %1211 = shalt.err (!%p1208_p2)
}
   0xf   :  { %s1212_s22 = scalar_lea.vmem %s46_s30, 32  ;;  %p1217_p4 = scmp.lt.s32.totalorder %s46_s30, %s46_s30 }
  0x10   :  { %p1213_p3 = scmp.ne.s32.totalorder %s46_s30, %s1212_s22  ;;  %p1218_p5 = scmp.lt.s32.totalorder %s1212_s22, %s1212_s22 }
  0x12   :  { %p1219_p6 = por %p1218_p5, %p1217_p4 }
  0x14   :  { %p1220_p7 = pnand %p1219_p6, %p1213_p3 }
  0x16   :  { %1223 = shalt.err (!%p1220_p7)
}
  0x17   :  { %48 = dma.hbm_to_vmem [thread:$0]  %s1972_s1, 32, %s46_s30, [#allocation6]  }
  0x18   :  { %s1551_s25 = smov [#allocation8]   ;;  %s1224_s29 = scalar_lea.hbm %s1974_s3, 128 }
  0x19   :  { %s66_s26 = sshll.u32 %s1551_s25, 4  ;;  %p1225_p8 = scmp.ne.s32.totalorder %s1974_s3, %s1224_s29  ;;  %s67_s26 = int_to_ptr.vmem [resolvable:$true] %s66_s26 }
  0x1a   :  { %p1228_p9 = scmp.lt.u32.totalorder %s1224_s29, %s1974_s3 }
  0x1c   :  { %p1230_p10 = pnand %p1228_p9, %p1225_p8 }
  0x1e   :  { %1233 = shalt.err (!%p1230_p10)
}
  0x1f   :  { %s1234_s19 = scalar_lea.vmem %s67_s26, 128  ;;  %p1239_p12 = scmp.lt.s32.totalorder %s67_s26, %s67_s26 }
  0x20   :  { %p1235_p11 = scmp.ne.s32.totalorder %s67_s26, %s1234_s19  ;;  %p1240_p13 = scmp.lt.s32.totalorder %s1234_s19, %s1234_s19 }
  0x22   :  { %p1241_p0 = por %p1240_p13, %p1239_p12 }
  0x24   :  { %p1242_p1 = pnand %p1241_p0, %p1235_p11 }
  0x26   :  { %1245 = shalt.err (!%p1242_p1)
}
  0x27   :  { %s1552_s1 = smov 64   ;;  %s1553_s30 = smov 4  }
  0x28   :  { %72 = dma.hbm_to_vmem [thread:$0]  %s1974_s3, 128, %s67_s26, [#allocation9], %s1552_s1, %s1552_s1, %s1553_s30  }
  0x29   :  { %s1554_s22 = smov [#allocation11]   ;;  %s1555_s24 = smov [#allocation14]  }
  0x2a   :  { %s90_s23 = sshll.u32 %s1554_s22, 4  ;;  %s115_s25 = sshll.u32 %s1555_s24, 4  ;;  %s91_s23 = int_to_ptr.vmem [resolvable:$true] %s90_s23  ;;  %s1676_s25 = int_to_ptr.vmem [resolvable:$true] %s115_s25 }
  0x2b   :  { %s1246_s29 = scalar_lea.hbm %s1976_s5, 64 }
  0x2c   :  { %p1247_p2 = scmp.ne.s32.totalorder %s1976_s5, %s1246_s29  ;;  %p1250_p3 = scmp.lt.u32.totalorder %s1246_s29, %s1976_s5 }
  0x2e   :  { %p1252_p4 = pnand %p1250_p3, %p1247_p2 }
  0x30   :  { %1255 = shalt.err (!%p1252_p4)
}
  0x31   :  { %s1256_s3 = scalar_lea.vmem %s91_s23, 64  ;;  %p1261_p6 = scmp.lt.s32.totalorder %s91_s23, %s91_s23 }
  0x32   :  { %p1257_p5 = scmp.ne.s32.totalorder %s91_s23, %s1256_s3  ;;  %p1262_p7 = scmp.lt.s32.totalorder %s1256_s3, %s1256_s3 }
  0x34   :  { %p1263_p8 = por %p1262_p7, %p1261_p6 }
  0x36   :  { %p1264_p9 = pnand %p1263_p8, %p1257_p5 }
  0x38   :  { %1267 = shalt.err (!%p1264_p9)
}
  0x39   :  { %s1556_s26 = smov 32   ;;  %s1557_s19 = smov 2  }
  0x3a   :  { %96 = dma.hbm_to_vmem [thread:$0]  %s1976_s5, 64, %s91_s23, [#allocation12], %s1556_s26, %s1556_s26, %s1557_s19  }
  0x3b   :  { %s1268_s27 = scalar_lea.hbm %s1978_s7, 16 }
  0x3c   :  { %p1269_p10 = scmp.ne.s32.totalorder %s1978_s7, %s1268_s27  ;;  %p1272_p11 = scmp.lt.u32.totalorder %s1268_s27, %s1978_s7 }
  0x3e   :  { %p1274_p12 = pnand %p1272_p11, %p1269_p10 }
  0x40   :  { %1277 = shalt.err (!%p1274_p12)
}
  0x41   :  { %s1278_s17 = scalar_lea.vmem %s1676_s25, 16  ;;  %s1282_s5 = scalar_lea.vmem %s1676_s25, 32 }
  0x42   :  { %p1279_p13 = scmp.ne.s32.totalorder %s1676_s25, %s1278_s17  ;;  %p1283_p0 = scmp.lt.s32.totalorder %s1676_s25, %s1676_s25 }
  0x43   :  { %p1284_p1 = scmp.lt.s32.totalorder %s1282_s5, %s1278_s17 }
  0x45   :  { %p1285_p2 = por %p1284_p1, %p1283_p0 }
  0x47   :  { %p1286_p3 = pnand %p1285_p2, %p1279_p13 }
  0x49   :  { %1289 = shalt.err (!%p1286_p3)
}
  0x4a   :  { %118 = dma.hbm_to_vmem [thread:$0]  %s1978_s7, 16, %s1676_s25, [#allocation15]  }
  0x4b   :  { %s1558_s3 = smov [#allocation17]   ;;  %s1559_s21 = smov [#allocation20]  }
  0x4c   :  { %s137_s20 = sshll.u32 %s1558_s3, 4  ;;  %s156_s22 = sshll.u32 %s1559_s21, 4  ;;  %s138_s20 = int_to_ptr.vmem [resolvable:$true] %s137_s20  ;;  %s1711_s22 = int_to_ptr.vmem [resolvable:$true] %s156_s22 }
  0x4d   :  { %s1290_s28 = scalar_lea.hbm %s1980_s9, 16 }
  0x4e   :  { %p1291_p4 = scmp.ne.s32.totalorder %s1980_s9, %s1290_s28  ;;  %p1294_p5 = scmp.lt.u32.totalorder %s1290_s28, %s1980_s9 }
  0x50   :  { %p1296_p6 = pnand %p1294_p5, %p1291_p4 }
  0x52   :  { %1299 = shalt.err (!%p1296_p6)
}
  0x53   :  { %s1300_s7 = scalar_lea.vmem %s138_s20, 16  ;;  %s1304_s25 = scalar_lea.vmem %s138_s20, 32 }
  0x54   :  { %p1301_p7 = scmp.ne.s32.totalorder %s138_s20, %s1300_s7  ;;  %p1305_p8 = scmp.lt.s32.totalorder %s138_s20, %s138_s20 }
  0x55   :  { %p1306_p9 = scmp.lt.s32.totalorder %s1304_s25, %s1300_s7 }
  0x57   :  { %p1307_p10 = por %p1306_p9, %p1305_p8 }
  0x59   :  { %p1308_p11 = pnand %p1307_p10, %p1301_p7 }
  0x5b   :  { %1311 = shalt.err (!%p1308_p11)
}
  0x5c   :  { %140 = dma.hbm_to_vmem [thread:$0]  %s1980_s9, 16, %s138_s20, [#allocation18]  }
  0x5d   :  { %s1312_s21 = scalar_lea.hbm %s1982_s11, 768 }
  0x5e   :  { %p1313_p12 = scmp.ne.s32.totalorder %s1982_s11, %s1312_s21  ;;  %p1316_p13 = scmp.lt.u32.totalorder %s1312_s21, %s1982_s11 }
  0x60   :  { %p1318_p0 = pnand %p1316_p13, %p1313_p12 }
  0x62   :  { %1321 = shalt.err (!%p1318_p0)
}
  0x63   :  { %s1322_s15 = scalar_lea.vmem %s1711_s22, 768  ;;  %p1327_p2 = scmp.lt.s32.totalorder %s1711_s22, %s1711_s22 }
  0x64   :  { %p1323_p1 = scmp.ne.s32.totalorder %s1711_s22, %s1322_s15  ;;  %p1328_p3 = scmp.lt.s32.totalorder %s1322_s15, %s1322_s15 }
  0x66   :  { %p1329_p4 = por %p1328_p3, %p1327_p2 }
  0x68   :  { %p1330_p5 = pnand %p1329_p4, %p1323_p1 }
  0x6a   :  { %1333 = shalt.err (!%p1330_p5)
}
  0x6b   :  { %162 = dma.hbm_to_vmem [thread:$0]  %s1982_s11, 768, %s1711_s22, [#allocation21], %s1552_s1, %s1552_s1, %s1553_s30  }
  0x6c   :  { %s1560_s16 = smov [#allocation2]   ;;  %s1561_s7 = smov [#allocation7]  }
  0x6d   :  { %s35_s17 = sshll.u32 %s1560_s16, 4  ;;  %s54_s25 = sshll.u32 %s1561_s7, 4  ;;  %s36_s17 = int_to_ptr.vmem [resolvable:$true] %s35_s17  ;;  %s1745_s25 = int_to_ptr.vmem [resolvable:$true] %s54_s25 }
  0x6e   :  { %s1334_s18 = scalar_lea.hbm %s1971_s0, 32 }
  0x6f   :  { %p1335_p6 = scmp.ne.s32.totalorder %s1971_s0, %s1334_s18  ;;  %p1338_p7 = scmp.lt.u32.totalorder %s1334_s18, %s1971_s0 }
  0x71   :  { %p1340_p8 = pnand %p1338_p7, %p1335_p6 }
  0x73   :  { %1343 = shalt.err (!%p1340_p8)
}
  0x74   :  { %s1344_s11 = scalar_lea.vmem %s36_s17, 32  ;;  %p1349_p10 = scmp.lt.s32.totalorder %s36_s17, %s36_s17 }
  0x75   :  { %p1345_p9 = scmp.ne.s32.totalorder %s36_s17, %s1344_s11  ;;  %p1350_p11 = scmp.lt.s32.totalorder %s1344_s11, %s1344_s11 }
  0x77   :  { %p1351_p12 = por %p1350_p11, %p1349_p10 }
  0x79   :  { %p1352_p13 = pnand %p1351_p12, %p1345_p9 }
  0x7b   :  { %1355 = shalt.err (!%p1352_p13)
}
  0x7c   :  { %38 = dma.hbm_to_vmem [thread:$0]  %s1971_s0, 32, %s36_s17, [#allocation3]  }
  0x7d   :  { %s1356_s9 = scalar_lea.hbm %s1973_s2, 128 }
  0x7e   :  { %p1357_p0 = scmp.ne.s32.totalorder %s1973_s2, %s1356_s9  ;;  %p1360_p1 = scmp.lt.u32.totalorder %s1356_s9, %s1973_s2 }
  0x80   :  { %p1362_p2 = pnand %p1360_p1, %p1357_p0 }
  0x82   :  { %1365 = shalt.err (!%p1362_p2)
}
  0x83   :  { %s1366_s23 = scalar_lea.vmem %s1745_s25, 128  ;;  %p1371_p4 = scmp.lt.s32.totalorder %s1745_s25, %s1745_s25 }
  0x84   :  { %p1367_p3 = scmp.ne.s32.totalorder %s1745_s25, %s1366_s23  ;;  %p1372_p5 = scmp.lt.s32.totalorder %s1366_s23, %s1366_s23 }
  0x86   :  { %p1373_p6 = por %p1372_p5, %p1371_p4 }
  0x88   :  { %p1374_p7 = pnand %p1373_p6, %p1367_p3 }
  0x8a   :  { %1377 = shalt.err (!%p1374_p7)
}
  0x8b   :  { %60 = dma.hbm_to_vmem [thread:$0]  %s1973_s2, 128, %s1745_s25, [#allocation6], %s1552_s1, %s1552_s1, %s1553_s30  }
  0x8c   :  { %s1562_s18 = smov [#allocation10]   ;;  %s1563_s21 = smov [#allocation13]  }
  0x8d   :  { %s78_s3 = sshll.u32 %s1562_s18, 4  ;;  %s102_s24 = sshll.u32 %s1563_s21, 4  ;;  %s79_s3 = int_to_ptr.vmem [resolvable:$true] %s78_s3  ;;  %s1779_s24 = int_to_ptr.vmem [resolvable:$true] %s102_s24 }
  0x8e   :  { %s1378_s22 = scalar_lea.hbm %s1975_s4, 64 }
  0x8f   :  { %p1379_p8 = scmp.ne.s32.totalorder %s1975_s4, %s1378_s22  ;;  %p1382_p9 = scmp.lt.u32.totalorder %s1378_s22, %s1975_s4 }
  0x91   :  { %p1384_p10 = pnand %p1382_p9, %p1379_p8 }
  0x93   :  { %1387 = shalt.err (!%p1384_p10)
}
  0x94   :  { %s1388_s2 = scalar_lea.vmem %s79_s3, 64  ;;  %p1393_p12 = scmp.lt.s32.totalorder %s79_s3, %s79_s3 }
  0x95   :  { %p1389_p11 = scmp.ne.s32.totalorder %s79_s3, %s1388_s2  ;;  %p1394_p13 = scmp.lt.s32.totalorder %s1388_s2, %s1388_s2 }
  0x97   :  { %p1395_p0 = por %p1394_p13, %p1393_p12 }
  0x99   :  { %p1396_p1 = pnand %p1395_p0, %p1389_p11 }
  0x9b   :  { %1399 = shalt.err (!%p1396_p1)
}
  0x9c   :  { %84 = dma.hbm_to_vmem [thread:$0]  %s1975_s4, 64, %s79_s3, [#allocation9], %s1556_s26, %s1556_s26, %s1557_s19  }
  0x9d   :  { %s1400_s5 = scalar_lea.hbm %s1977_s6, 1024 }
  0x9e   :  { %p1401_p2 = scmp.ne.s32.totalorder %s1977_s6, %s1400_s5  ;;  %p1404_p3 = scmp.lt.u32.totalorder %s1400_s5, %s1977_s6 }
  0xa0   :  { %p1406_p4 = pnand %p1404_p3, %p1401_p2 }
  0xa2   :  { %1409 = shalt.err (!%p1406_p4)
}
  0xa3   :  { %s1410_s21 = scalar_lea.vmem %s1779_s24, 1024  ;;  %p1415_p6 = scmp.lt.s32.totalorder %s1779_s24, %s1779_s24 }
  0xa4   :  { %p1411_p5 = scmp.ne.s32.totalorder %s1779_s24, %s1410_s21  ;;  %p1416_p7 = scmp.lt.s32.totalorder %s1410_s21, %s1410_s21 }
  0xa6   :  { %p1417_p8 = por %p1416_p7, %p1415_p6 }
  0xa8   :  { %p1418_p9 = pnand %p1417_p8, %p1411_p5 }
  0xaa   :  { %1421 = shalt.err (!%p1418_p9)
}
  0xab   :  { %108 = dma.hbm_to_vmem [thread:$0]  %s1977_s6, 1024, %s1779_s24, [#allocation12], %s1552_s1, %s1552_s1, %s1553_s30  }
  0xac   :  { %s1564_s27 = smov [#allocation16]   ;;  %s1565_s22 = smov [#allocation19]  }
  0xad   :  { %s124_s11 = sshll.u32 %s1564_s27, 4  ;;  %s147_s28 = sshll.u32 %s1565_s22, 4  ;;  %s125_s11 = int_to_ptr.vmem [resolvable:$true] %s124_s11  ;;  %s148_s28 = int_to_ptr.vmem [resolvable:$true] %s147_s28 }
  0xae   :  { %s1422_s9 = scalar_lea.hbm %s1979_s8, 256 }
  0xaf   :  { %p1423_p10 = scmp.ne.s32.totalorder %s1979_s8, %s1422_s9  ;;  %p1426_p11 = scmp.lt.u32.totalorder %s1422_s9, %s1979_s8 }
  0xb1   :  { %p1428_p12 = pnand %p1426_p11, %p1423_p10 }
  0xb3   :  { %1431 = shalt.err (!%p1428_p12)
}
  0xb4   :  { %s1432_s6 = scalar_lea.vmem %s125_s11, 256  ;;  %p1437_p0 = scmp.lt.s32.totalorder %s125_s11, %s125_s11 }
  0xb5   :  { %p1433_p13 = scmp.ne.s32.totalorder %s125_s11, %s1432_s6  ;;  %p1438_p1 = scmp.lt.s32.totalorder %s1432_s6, %s1432_s6 }
  0xb7   :  { %p1439_p2 = por %p1438_p1, %p1437_p0 }
  0xb9   :  { %p1440_p3 = pnand %p1439_p2, %p1433_p13 }
  0xbb   :  { %1443 = shalt.err (!%p1440_p3)
}
  0xbc   :  { %130 = dma.hbm_to_vmem [thread:$0]  %s1979_s8, 256, %s125_s11, [#allocation15], %s1552_s1, %s1552_s1, %s1553_s30  }
  0xbd   :  { %s1444_s0 = scalar_lea.hbm %s1981_s10, 16 }
  0xbe   :  { %p1445_p4 = scmp.ne.s32.totalorder %s1981_s10, %s1444_s0  ;;  %p1448_p5 = scmp.lt.u32.totalorder %s1444_s0, %s1981_s10 }
  0xc0   :  { %p1450_p6 = pnand %p1448_p5, %p1445_p4 }
  0xc2   :  { %1453 = shalt.err (!%p1450_p6)
}
  0xc3   :  { %s1454_s3 = scalar_lea.vmem %s148_s28, 16  ;;  %s1458_s27 = scalar_lea.vmem %s148_s28, 32 }
  0xc4   :  { %p1455_p7 = scmp.ne.s32.totalorder %s148_s28, %s1454_s3  ;;  %p1459_p8 = scmp.lt.s32.totalorder %s148_s28, %s148_s28 }
  0xc5   :  { %p1460_p9 = scmp.lt.s32.totalorder %s1458_s27, %s1454_s3 }
  0xc7   :  { %p1461_p10 = por %p1460_p9, %p1459_p8 }
  0xc9   :  { %p1462_p11 = pnand %p1461_p10, %p1455_p7 }
  0xcb   :  { %1465 = shalt.err (!%p1462_p11)
}
  0xcc   :  { %150 = dma.hbm_to_vmem [thread:$0]  %s1981_s10, 16, %s148_s28, [#allocation18]  }
  0xcd   :  { %s1566_s11 = smov [#allocation22]   ;;  %s1466_s9 = scalar_lea.hbm %s1983_s12, 16 }
  0xce   :  { %s169_s22 = sshll.u32 %s1566_s11, 4  ;;  %p1467_p12 = scmp.ne.s32.totalorder %s1983_s12, %s1466_s9  ;;  %s170_s22 = int_to_ptr.vmem [resolvable:$true] %s169_s22 }
  0xcf   :  { %p1470_p13 = scmp.lt.u32.totalorder %s1466_s9, %s1983_s12 }
  0xd1   :  { %p1472_p0 = pnand %p1470_p13, %p1467_p12 }
  0xd3   :  { %1475 = shalt.err (!%p1472_p0)
}
  0xd4   :  { %s1476_s6 = scalar_lea.vmem %s170_s22, 16  ;;  %s1480_s10 = scalar_lea.vmem %s170_s22, 32 }
  0xd5   :  { %p1477_p1 = scmp.ne.s32.totalorder %s170_s22, %s1476_s6  ;;  %p1481_p2 = scmp.lt.s32.totalorder %s170_s22, %s170_s22 }
  0xd6   :  { %p1482_p3 = scmp.lt.s32.totalorder %s1480_s10, %s1476_s6 }
  0xd8   :  { %p1483_p4 = por %p1482_p3, %p1481_p2 }
  0xda   :  { %p1484_p5 = pnand %p1483_p4, %p1477_p1 }
  0xdc   :  { %1487 = shalt.err (!%p1484_p5)
}
  0xdd   :  { %172 = dma.hbm_to_vmem [thread:$0]  %s1983_s12, 16, %s170_s22, [#allocation21]  }
  0xde   :  { %1532 = dma.done.wait [#allocation3], 32  }
  0xdf   :  { %1533 = vsyncadd [#allocation3], 4294967264 }
  0xe0   :  { %1534 = dma.done.wait [#allocation6], 160  }
  0xe1   :  { %1535 = vsyncadd [#allocation6], 4294967136 }
  0xe2   :  { %1536 = dma.done.wait [#allocation9], 192  }
  0xe3   :  { %1537 = vsyncadd [#allocation9], 4294967104 }
  0xe4   :  { %1538 = dma.done.wait [#allocation12], 1088  }
  0xe5   :  { %1539 = vsyncadd [#allocation12], 4294966208 }
  0xe6   :  { %1540 = dma.done.wait [#allocation15], 272  }
  0xe7   :  { %1541 = vsyncadd [#allocation15], 4294967024 }
  0xe8   :  { %1542 = dma.done.wait [#allocation18], 32  }
  0xe9   :  { %1543 = vsyncadd [#allocation18], 4294967264 }
  0xea   :  { %1544 = dma.done.wait [#allocation21], 784  }
  0xeb   :  { %1545 = vsyncadd [#allocation21], 4294966512  ;;  %v1567_v0 = vmov 0.0   ;;  %vm1568_vm0 = vmmov 0   ;;  %v1158_v1 = vld [vmem:[#allocation13 + $0x10] sm:$0xff]   ;;  %v1159_v2 = vld [vmem:[#allocation13] sm:$0xff]   ;;  %v578_v61 = vlaneseq }
  0xec   :  { %1068 = vmatprep.subr.bf16.mxu0 %v1567_v0  ;;  %1076 = vmatprep.subr.bf16.mxu1 %v1567_v0  ;;  %v1160_v3 = vld [vmem:[#allocation13 + $0x18] sm:$0xff]   ;;  %v1161_v4 = vld [vmem:[#allocation13 + $0x8] sm:$0xff]   ;;  %v224_v5 = vld [vmem:[#allocation5] sm:$0x3]  ;;  %vm242_vm1 = vcmask 261120   ;;  %vm638_vm2 = vcmask 1041409  }
  0xed   :  { %1072 = vmatprep.mubr.msk.bf16.mxu0 %vm1568_vm0, %v1567_v0  ;;  %1080 = vmatprep.mubr.msk.bf16.mxu1 %vm1568_vm0, %v1567_v0  ;;  %v215_v6 = vld [vmem:[#allocation10 + $0x2] sm:$0x3]  ;;  %v225_v7 = vpack.c.bf16 %v224_v5, %v224_v5  ;;  %v1162_v9 = vld [vmem:[#allocation13 + $0x20] sm:$0xff]   ;;  %v1163_v10 = vld [vmem:[#allocation13 + $0x30] sm:$0xff]   ;;  %v1569_v59 = vmov 1966171168  }
  0xee   :  { %1069 = vmatpush3.bf16.msra.mxu0 %v1158_v1  ;;  %1077 = vmatpush3.bf16.msra.mxu1 %v1159_v2  ;;  %v1863_v8 = vpack.c.bf16 %v215_v6, %v215_v6  ;;  %v1164_v11 = vld [vmem:[#allocation13 + $0x28] sm:$0xff]   ;;  %v341_v12 = vld [vmem:[#allocation2] sm:$0x3]  ;;  %v1165_v13 = vld [vmem:[#allocation13 + $0x38] sm:$0xff]   ;;  %v576_v60 = vunpack.c.l.s4 %v1569_v59  ;;  %v1906_v63 = vshrl.u32 %v578_v61, 7  ;;  %vm641_vm3 = vcmask 58368  }
  0xef   :  { %1070 = vmatprep.subr.bf16.mxu0 %v1567_v0  ;;  %1078 = vmatprep.subr.bf16.mxu1 %v1567_v0  ;;  %v213_v14 = vld [vmem:[#allocation10] sm:$0x3]  ;;  %v342_v15 = vpack.c.bf16 %v341_v12, %v341_v12  ;;  %v1018_v30 = vld [vmem:[#allocation14] ss:$0 sm:$0xff]  ;;  %v216_v39 = vld [vmem:[#allocation11] sm:$0x3] }
  0xf0   :  { %v403_v16 = vpack.c.bf16 %v213_v14, %v213_v14  ;;  %v1166_v50 = vld [vmem:[#allocation16] sm:$0xff]   ;;  %v1168_v52 = vld [vmem:[#allocation16 + $0x8] sm:$0xff]   ;;  %v577_v62 = vunpack.c.0.s8 %v576_v60  ;;  %v1020_v1 = vld [vmem:[#allocation17] ss:$0 sm:$0xff]  ;;  %s1571_s12 = smov 96   ;;  %vm948_vm4 = vcmask 254976  }
  0xf1   :  { %v1167_v51 = vld [vmem:[#allocation20 + $0x10] sm:$0xff]   ;;  %v1169_v53 = vld [vmem:[#allocation20 + $0x18] sm:$0xff]   ;;  %s1572_s7 = smov [#allocation23]   ;;  %s1573_s5 = smov [#allocation24]  }
  0xf2   :  { %1071 = vmatpush3.bf16.msra.mxu0 %v1160_v3  ;;  %1079 = vmatpush3.bf16.msra.mxu1 %v1161_v4  ;;  %v580_v2 = vsub.s32 %v577_v62, %v1906_v63  ;;  %s984_s23 = sshll.u32 %s1573_s5, 4  ;;  %s985_s23 = int_to_ptr.vmem [resolvable:$true] %s984_s23 }
  0xf3   :  { %1084 = vmatprep.subr.bf16.mxu0 %v1567_v0  ;;  %1092 = vmatprep.subr.bf16.mxu1 %v1567_v0 }
  0xf5   :  { %1073 = vmatmul.mubr.msk.bf16.vlgmr.msra.gmra.mrb[0].mxu0 %vm242_vm1, %v225_v7  ;;  %1081 = vmatmul.mubr.msk.bf16.vlgmr.msra.gmra.mrb[0].mxu1 %vm242_vm1, %v1863_v8 }
  0xf6   :  { %1085 = vmatpush3.bf16.msra.mxu0 %v1162_v9  ;;  %1093 = vmatpush3.bf16.msra.mxu1 %v1163_v10  ;;  %v1037_v9 = vld [vmem:[#allocation8] sm:$0xff]  }
  0xf7   :  { %1086 = vmatprep.subr.bf16.mxu0 %v1567_v0  ;;  %1094 = vmatprep.subr.bf16.mxu1 %v1567_v0 }
  0xf8   :  { %1088 = vmatprep.mubr.msk.bf16.mxu0 %vm1568_vm0, %v1567_v0  ;;  %1096 = vmatprep.mubr.msk.bf16.mxu1 %vm1568_vm0, %v1567_v0 }
  0xfa   :  { %1087 = vmatpush3.bf16.msra.mxu0 %v1164_v11  ;;  %1095 = vmatpush3.bf16.msra.mxu1 %v1165_v13  ;;  %v599_v13 = vsub.s32 0, %v1906_v63 }
  0xfb   :  { %1100 = vmatprep.subr.bf16.mxu0 %v1567_v0  ;;  %1108 = vmatprep.subr.bf16.mxu1 %v1567_v0 }
  0xfd   :  { %1089 = vmatmul.mubr.msk.bf16.vlgmr.msra.gmra.mrb[4].mxu0 %vm242_vm1, %v342_v15  ;;  %1097 = vmatmul.mubr.msk.bf16.vlgmr.msra.gmra.mrb[4].mxu1 %vm242_vm1, %v403_v16  ;;  %v1038_v16 = vunpack.c.l.bf16 %v1037_v9 }
  0xfe   :  { %1104 = vmatprep.mubr.msk.bf16.mxu0 %vm1568_vm0, %v1567_v0  ;;  %1112 = vmatprep.mubr.msk.bf16.mxu1 %vm1568_vm0, %v1567_v0 }
  0xff   :  { %1101 = vmatpush3.bf16.msra.mxu0 %v1166_v50  ;;  %1109 = vmatpush3.bf16.msra.mxu1 %v1167_v51 }
 0x100   :  { %1102 = vmatprep.subr.bf16.mxu0 %v1567_v0  ;;  %1110 = vmatprep.subr.bf16.mxu1 %v1567_v0 }
 0x103   :  { %1103 = vmatpush3.bf16.msra.mxu0 %v1168_v52  ;;  %1111 = vmatpush3.bf16.msra.mxu1 %v1169_v53 }
 0x104   :  { %1116 = vmatprep.subr.bf16.mxu0 %v1567_v0  ;;  %1124 = vmatprep.subr.bf16.mxu1 %v1567_v0 }
 0x1c8   :  { %v280_v17 = vpop.f32.mrb[0].mxu0  ;;  %v335_v18 = vpop.f32.mrb[0].mxu1 }
 0x1c9   :  { %v1074_v19 = vpop.f32.mrb[1].mxu0  ;;  %v336_v20 = vadd.f32 %v335_v18, %v280_v17  ;;  %v1082_v21 = vpop.f32.mrb[1].mxu1 }
 0x1ca   :  { %v283_v22 = vpop.f32.mrb[2].mxu0  ;;  %v338_v23 = vpop.f32.mrb[2].mxu1  ;;  %v1039_v19 = vunpack.c.h.bf16 %v1037_v9  ;;  %v218_v9 = vld [vmem:[#allocation11 + $0x2] sm:$0x3] }
 0x1cb   :  { %v1075_v24 = vpop.f32.mrb[3].mxu0  ;;  %v1083_v25 = vpop.f32.mrb[3].mxu1 }
 0x1cc   :  { %v1024_v25 = vld [vmem:[#allocation19] ss:$0 sm:$0xff] }
 0x1d0   :  { %v396_v26 = vpop.f32.mrb[4].mxu0  ;;  %v457_v28 = vpop.f32.mrb[4].mxu1 }
 0x1d1   :  { %v402_v27 = vadd.f32 %v396_v26, %v336_v20  ;;  %v1090_v29 = vpop.f32.mrb[5].mxu0  ;;  %v1098_v31 = vpop.f32.mrb[5].mxu1 }
 0x1d2   :  { %v399_v32 = vpop.f32.mrb[6].mxu0  ;;  %v460_v34 = vpop.f32.mrb[6].mxu1 }
 0x1d3   :  { %v463_v33 = vadd.f32 %v457_v28, %v402_v27  ;;  %v1091_v35 = vpop.f32.mrb[7].mxu0  ;;  %v1099_v36 = vpop.f32.mrb[7].mxu1  ;;  %v629_v32 = vand.u32 127, %v578_v61 }
 0x1d5   :  { %v471_v37 = vadd.f32 %v1018_v30, %v463_v33  ;;  %v632_v33 = vsub.s32 %v629_v32, %v1906_v63 }
 0x1d7   :  { %1174 = vtanh.f32 %v471_v37  ;;  %v1019_v40 = vmul.f32 -1.442695, %v471_v37 }
 0x1d9   :  { %1176 = vpow2.f32 %v1019_v40  ;;  %v1570_v40 = vmov 0  }
 0x1da   :  { %1157 = vset.pattern.permute.xlu0 %v1570_v40  ;;  %1156 = vset.pattern.permute.xlu1 %v1570_v40 }
 0x1e1   :  { %v1175_v38 = vpop.eup %1174 }
 0x1e2   :  { %485 = vrot.lane.b32.xlu0 %v1175_v38, %s1552_s1 }
 0x1e3   :  { %v1177_v41 = vpop.eup %1176 }
 0x1e4   :  { %v475_v42 = vadd.f32 1.0, %v1177_v41  ;;  %v652_v41 = vsub.s32 1, %v1906_v63 }
 0x1e6   :  { %480 = vrot.lane.b32.xlu0 %v216_v39, %s1556_s26  ;;  %1178 = vrcp.f32 %v475_v42 }
 0x1f0   :  { %v1179_v43 = vpop.eup %1178 }
 0x254   :  { %v486_v44 = vpop.permute.xlu0 %485 }
 0x255   :  { %v488_v45 = vmul.f32 %v1179_v43, %v486_v44 }
 0x257   :  { %490 = vrot.lane.b32.xlu1 %v488_v45, %s1556_s26 }
 0x258   :  { %v481_v46 = vpop.permute.xlu0 %480 }
 0x259   :  { %v483_v47 = vmul.f32 %v1179_v43, %v481_v46 }
 0x2c9   :  { %v491_v48 = vpop.permute.xlu1 %490 }
 0x2ca   :  { %v1887_v49 = vadd.f32 %v491_v48, %v483_v47 }
 0x2cc   :  { %1180 = vtanh.f32 %v1887_v49 }
 0x2d6   :  { %v1181_v54 = vpop.eup %1180 }
 0x2d7   :  { %496 = vrot.lane.b32.xlu1 %v1181_v54, %s1552_s1 }
 0x349   :  { %v497_v55 = vpop.permute.xlu1 %496 }
 0x34a   :  { %v1895_v56 = vmul.f32 %v1179_v43, %v497_v55 }
 0x34c   :  { %v500_v57 = vpack.c.bf16 %v1895_v56, %v1895_v56 }
 0x34e   :  { %513 = vrot.lane.b32.xlu0 %v500_v57, %s1556_s26 }
 0x3c0   :  { %v514_v58 = vpop.permute.xlu0 %513 }
 0x3c1   :  { %1105 = vmatmul.mubr.msk.bf16.vlgmr.msra.gmra.mrb[8].mxu0 %vm242_vm1, %v514_v58  ;;  %1113 = vmatmul.mubr.msk.bf16.vlgmr.msra.gmra.mrb[8].mxu1 %vm242_vm1, %v514_v58 }
 0x3c2   :  { %1120 = vmatprep.mubr.msk.bf16.mxu0 %vm1568_vm0, %v1567_v0  ;;  %1128 = vmatprep.mubr.msk.bf16.mxu1 %vm1568_vm0, %v1567_v0 }
 0x494   :  { %v564_v3 = vpop.f32.mrb[8].mxu0  ;;  %v1909_v4 = vpop.f32.mrb[8].mxu1 }
 0x495   :  { %v565_v5 = vadd.f32 %v1020_v1, %v564_v3  ;;  %v1106_v6 = vpop.f32.mrb[9].mxu0  ;;  %v1114_v7 = vpop.f32.mrb[9].mxu1  ;;  %v1171_v3 = vld [vmem:[#allocation20 + $0x20] sm:$0xff]  }
 0x496   :  { %v567_v10 = vpop.f32.mrb[10].mxu0  ;;  %v787_v11 = vpop.f32.mrb[10].mxu1  ;;  %1125 = vmatpush3.bf16.msra.mxu1 %v1171_v3  ;;  %v1172_v6 = vld [vmem:[#allocation20 + $0x8] sm:$0xff]  }
 0x497   :  { %v581_v12 = vrot.slane %v565_v5, %v580_v2  ;;  %v1107_v14 = vpop.f32.mrb[11].mxu0  ;;  %v1115_v15 = vpop.f32.mrb[11].mxu1  ;;  %v1170_v5 = vld [vmem:[#allocation20] sm:$0xff]   ;;  %1126 = vmatprep.subr.bf16.mxu1 %v1567_v0  ;;  %v1173_v7 = vld [vmem:[#allocation20 + $0x28] sm:$0xff]   ;;  %v1041_v10 = vld [vmem:[#allocation7] sm:$0xff]  }
 0x498   :  { %1117 = vmatpush3.bf16.msra.mxu0 %v1170_v5  ;;  %v1042_v11 = vunpack.c.l.bf16 %v1041_v10  ;;  %v1043_v14 = vunpack.c.h.bf16 %v1041_v10 }
 0x499   :  { %v582_v17 = vcombine.high %v581_v12, %v581_v12  ;;  %v589_v18 = vrot.slane %v581_v12, %v580_v2  ;;  %1118 = vmatprep.subr.bf16.mxu0 %v1567_v0 }
 0x49a   :  { %1127 = vmatpush3.bf16.msra.mxu1 %v1173_v7 }
 0x49b   :  { %v596_v20 = vrot.slane %v582_v17, %v580_v2  ;;  %v600_v21 = vrot.slane %v589_v18, %v599_v13 }
 0x49c   :  { %1119 = vmatpush3.bf16.msra.mxu0 %v1172_v6 }
 0x49d   :  { %v604_v22 = vrot.slane %v596_v20, %v599_v13  ;;  %v607_v23 = vadd.f32 %v1038_v16, %v600_v21  ;;  %1129 = vmatmul.mubr.msk.bf16.vlgmr.msra.gmra.mrb[12].mxu1 %vm242_vm1, %v1863_v8 }
 0x49f   :  { %v608_v24 = vadd.f32 %v1039_v19, %v604_v22  ;;  %1182 = vtanh.f32 %v607_v23 }
 0x4a1   :  { %1184 = vtanh.f32 %v608_v24 }
 0x4a9   :  { %v1183_v26 = vpop.eup %1182 }
 0x4aa   :  { %v618_v27 = vmul.f32 %v1183_v26, %v1024_v25 }
 0x4ab   :  { %v1185_v28 = vpop.eup %1184 }
 0x4ac   :  { %v620_v29 = vsel %vm242_vm1, %v618_v27, 0.0  ;;  %v619_v30 = vmul.f32 %v1185_v28, %v1024_v25 }
 0x4ad   :  { %621 = vadd.xlane.f32.xlu1 %v620_v29 }
 0x4ae   :  { %v623_v31 = vsel %vm242_vm1, %v619_v30, 0.0 }
 0x4af   :  { %624 = vadd.xlane.f32.xlu0 %v623_v31 }
 0x53a   :  { %v622_v34 = vpop.xlane.xlu1 %621 }
 0x53b   :  { %v633_v36 = vrot.slane %v622_v34, %v632_v33 }
 0x53c   :  { %v625_v35 = vpop.xlane.xlu0 %624 }
 0x53d   :  { %v637_v37 = vrot.slane %v625_v35, %v632_v33 }
 0x53f   :  { %v639_v38 = vsel %vm638_vm2, %v637_v37, %v633_v36 }
 0x540   :  { %v642_v39 = vsel %vm641_vm3, %v639_v38, -inf }
 0x541   :  { %643 = vmax.xlane.f32.xlu0 %v642_v39 }
 0x5ce   :  { %v644_v42 = vpop.xlane.xlu0 %643 }
 0x5cf   :  { %v649_v43 = vrot.slane %v644_v42, %v599_v13  ;;  %v653_v44 = vrot.slane %v644_v42, %v652_v41  ;;  %v1034_v42 = vld [vmem:[#allocation22] ss:$0 sm:$0xff] }
 0x5d1   :  { %v656_v45 = vsub.f32 %v622_v34, %v649_v43  ;;  %v657_v46 = vsub.f32 %v625_v35, %v653_v44  ;;  %v901_v35 = vpop.f32.mrb[12].mxu1 }
 0x5d2   :  { %v1130_v36 = vpop.f32.mrb[13].mxu1 }
 0x5d3   :  { %v658_v47 = vmul.f32 1.442695, %v656_v45  ;;  %v660_v48 = vmul.f32 1.442695, %v657_v46  ;;  %v904_v37 = vpop.f32.mrb[14].mxu1 }
 0x5d4   :  { %v1131_v38 = vpop.f32.mrb[15].mxu1 }
 0x5d5   :  { %1186 = vpow2.f32 %v658_v47 }
 0x5d6   :  { %1188 = vpow2.f32 %v660_v48 }
 0x5df   :  { %v1187_v50 = vpop.eup %1186 }
 0x5e0   :  { %v1189_v51 = vpop.eup %1188  ;;  %665 = vperm.xlu1 %1156, %v1187_v50  }
 0x5e1   :  { %668 = vperm.xlu0 %1157, %v1189_v51  }
 0x65f   :  { %v666_v52 = vpop.permute.xlu1 %665 }
 0x660   :  { %v669_v53 = vpop.permute.xlu0 %668  ;;  %v673_v54 = vrot.slane %v666_v52, %v632_v33 }
 0x661   :  { %v677_v55 = vrot.slane %v669_v53, %v632_v33 }
 0x663   :  { %v678_v57 = vsel %vm638_vm2, %v677_v55, %v673_v54 }
 0x664   :  { %v680_v58 = vsel %vm641_vm3, %v678_v57, 0.0 }
 0x665   :  { %681 = vadd.xlane.f32.xlu1 %v680_v58 }
 0x6f2   :  { %v682_v59 = vpop.xlane.xlu1 %681 }
 0x6f3   :  { %v687_v60 = vrot.slane %v682_v59, %v599_v13  ;;  %v691_v61 = vrot.slane %v682_v59, %v652_v41 }
 0x6f5   :  { %1190 = vrcp.f32 %v687_v60 }
 0x6f6   :  { %1192 = vrcp.f32 %v691_v61 }
 0x6ff   :  { %v1191_v62 = vpop.eup %1190 }
 0x700   :  { %v695_v63 = vmul.f32 %v1191_v62, %v1187_v50  ;;  %v1193_v1 = vpop.eup %1192 }
 0x701   :  { %v697_v2 = vmul.f32 %v1193_v1, %v1189_v51 }
 0x702   :  { %704 = vperm.xlu0 %1157, %v695_v63  }
 0x706   :  { %709 = vperm.xlu0 %1157, %v697_v2  }
 0x70a   :  { %924 = vrot.lane.b32.xlu0 %v218_v9, %s1556_s26 }
 0x781   :  { %v705_v12 = vpop.permute.xlu0 %704 }
 0x782   :  { %v712_v13 = vmul.f32 %v1042_v11, %v705_v12 }
 0x784   :  { %v714_v15 = vsel %vm242_vm1, %v712_v13, 0.0 }
 0x785   :  { %v715_v16 = vrot.slane %v714_v15, 4  ;;  %v710_v17 = vpop.permute.xlu0 %709 }
 0x786   :  { %v713_v0 = vmul.f32 %v1043_v14, %v710_v17 }
 0x787   :  { %v716_v18 = vadd.f32 %v715_v16, %v714_v15 }
 0x788   :  { %v721_v19 = vsel %vm242_vm1, %v713_v0, 0.0 }
 0x789   :  { %v717_v20 = vrot.slane %v716_v18, 2  ;;  %v722_v21 = vrot.slane %v721_v19, 4 }
 0x78b   :  { %v718_v22 = vadd.f32 %v717_v20, %v716_v18  ;;  %v723_v8 = vadd.f32 %v722_v21, %v721_v19 }
 0x78d   :  { %v719_v23 = vrot.slane %v718_v22, 1  ;;  %v724_v24 = vrot.slane %v723_v8, 2 }
 0x78f   :  { %v720_v25 = vadd.f32 %v719_v23, %v718_v22  ;;  %v725_v26 = vadd.f32 %v724_v24, %v723_v8 }
 0x791   :  { %v726_v27 = vrot.slane %v725_v26, 1  ;;  %v728_v28 = vpack.c.bf16 %v720_v25, %v720_v25 }
 0x793   :  { %v727_v29 = vadd.f32 %v726_v27, %v725_v26  ;;  %v792_v31 = vunpack.c.l.b16 %v728_v28 }
 0x795   :  { %v729_v30 = vpack.c.bf16 %v727_v29, %v727_v29 }
 0x797   :  { %v793_v32 = vunpack.c.l.b16 %v729_v30 }
 0x799   :  { %v794_v33 = vsel %vm638_vm2, %v793_v32, %v792_v31 }
 0x79a   :  { %v795_v34 = vpack.c.b16 %v794_v33, %v794_v33 }
 0x79c   :  { %1121 = vmatmul.mubr.msk.bf16.vlgmr.msra.gmra.mrb[12].mxu0 %vm242_vm1, %v795_v34 }
 0x86f   :  { %v845_v39 = vpop.f32.mrb[12].mxu0 }
 0x870   :  { %v846_v40 = vadd.f32 %v845_v39, %v1909_v4  ;;  %v1122_v41 = vpop.f32.mrb[13].mxu0  ;;  %v925_v4 = vpop.permute.xlu0 %924 }
 0x871   :  { %v848_v43 = vpop.f32.mrb[14].mxu0 }
 0x872   :  { %v907_v44 = vadd.f32 %v901_v35, %v846_v40  ;;  %v1123_v45 = vpop.f32.mrb[15].mxu0 }
 0x874   :  { %v915_v46 = vadd.f32 %v1034_v42, %v907_v44 }
 0x876   :  { %1194 = vtanh.f32 %v915_v46  ;;  %v1035_v48 = vmul.f32 -1.442695, %v915_v46 }
 0x878   :  { %1196 = vpow2.f32 %v1035_v48 }
 0x880   :  { %v1195_v47 = vpop.eup %1194 }
 0x881   :  { %929 = vrot.lane.b32.xlu1 %v1195_v47, %s1552_s1 }
 0x882   :  { %v1197_v50 = vpop.eup %1196 }
 0x883   :  { %v919_v51 = vadd.f32 1.0, %v1197_v50 }
 0x885   :  { %1198 = vrcp.f32 %v919_v51 }
 0x88f   :  { %v1199_v52 = vpop.eup %1198 }
 0x890   :  { %v927_v55 = vmul.f32 %v1199_v52, %v925_v4 }
 0x8f3   :  { %v930_v53 = vpop.permute.xlu1 %929 }
 0x8f4   :  { %v932_v54 = vmul.f32 %v1199_v52, %v930_v53 }
 0x8f6   :  { %934 = vrot.lane.b32.xlu0 %v932_v54, %s1556_s26 }
 0x968   :  { %v935_v57 = vpop.permute.xlu0 %934 }
 0x969   :  { %v937_v58 = vadd.f32 %v935_v57, %v927_v55 }
 0x96b   :  { %1200 = vtanh.f32 %v937_v58 }
 0x975   :  { %v1201_v59 = vpop.eup %1200 }
 0x976   :  { %940 = vrot.lane.b32.xlu0 %v1201_v59, %s1552_s1  ;;  %s972_s1 = sshll.u32 %s1572_s7, 4  ;;  %s973_s1 = int_to_ptr.vmem [resolvable:$true] %s972_s1 }
 0x977   :  { %s1488_s0 = scalar_lea.vmem %s973_s1, 64  ;;  %p1493_p7 = scmp.lt.s32.totalorder %s973_s1, %s973_s1 }
 0x978   :  { %p1489_p6 = scmp.ne.s32.totalorder %s973_s1, %s1488_s0  ;;  %p1494_p8 = scmp.lt.s32.totalorder %s1488_s0, %s1488_s0 }
 0x97a   :  { %945 = vrot.lane.b32.xlu0 %v1895_v56, %s1556_s26  ;;  %p1495_p9 = por %p1494_p8, %p1493_p7 }
 0x97c   :  { %p1496_p10 = pnand %p1495_p9, %p1489_p6 }
 0x97e   :  { %957 = vrot.lane.b32.xlu0 %v1887_v49, %s1571_s12 }
 0x9e8   :  { %v941_v60 = vpop.permute.xlu0 %940 }
 0x9e9   :  { %v943_v61 = vmul.f32 %v1199_v52, %v941_v60 }
 0x9eb   :  { %951 = vrot.lane.b32.xlu1 %v943_v61, %s1556_s26 }
 0x9ec   :  { %v946_v62 = vpop.permute.xlu0 %945 }
 0x9ed   :  { %949 = vst.msk [vmem:[#allocation23] sm:$0x3] %vm948_vm4, %v946_v62 }
 0x9ef   :  { %962 = vrot.lane.b32.xlu1 %v937_v58, %s1571_s12 }
 0x9f0   :  { %v958_v63 = vpop.permute.xlu0 %957 }
 0x9f1   :  { %960 = vst.msk [vmem:[#allocation24] sm:$0x3] %vm948_vm4, %v958_v63 }
 0xa5d   :  { %v952_v1 = vpop.permute.xlu1 %951 }
 0xa5e   :  { %955 = vst.msk [vmem:[#allocation23 + $0x2] sm:$0x3] %vm948_vm4, %v952_v1 }
 0xa5f   :  { %1499 = shalt.err (!%p1496_p10)
}
 0xa60   :  { %s1500_s21 = scalar_lea.hbm %s1984_s13, 64 }
 0xa61   :  { %p1501_p11 = scmp.ne.s32.totalorder %s1984_s13, %s1500_s21  ;;  %p1504_p12 = scmp.lt.u32.totalorder %s1500_s21, %s1984_s13 }
 0xa63   :  { %p1506_p13 = pnand %p1504_p12, %p1501_p11 }
 0xa65   :  { %1509 = shalt.err (!%p1506_p13)
}
 0xa66   :  { %978 = dma.vmem_to_hbm [thread:$0]  %s973_s1, 64, %s1984_s13, [#allocation4], %s1556_s26, %s1556_s26, %s1557_s19   ;;  %v963_v49 = vpop.permute.xlu1 %962 }
 0xa67   :  { %966 = vst.msk [vmem:[#allocation24 + $0x2] sm:$0x3] %vm948_vm4, %v963_v49  ;;  %s1510_s22 = scalar_lea.vmem %s985_s23, 64  ;;  %p1515_p1 = scmp.lt.s32.totalorder %s985_s23, %s985_s23 }
 0xa68   :  { %p1511_p0 = scmp.ne.s32.totalorder %s985_s23, %s1510_s22  ;;  %p1516_p2 = scmp.lt.s32.totalorder %s1510_s22, %s1510_s22 }
 0xa6a   :  { %p1517_p3 = por %p1516_p2, %p1515_p1 }
 0xa6c   :  { %p1518_p4 = pnand %p1517_p3, %p1511_p0 }
 0xa6e   :  { %1521 = shalt.err (!%p1518_p4)
}
 0xa6f   :  { %s1522_s9 = scalar_lea.hbm %s1985_s14, 64 }
 0xa70   :  { %p1523_p5 = scmp.ne.s32.totalorder %s1985_s14, %s1522_s9  ;;  %p1526_p6 = scmp.lt.u32.totalorder %s1522_s9, %s1985_s14 }
 0xa72   :  { %p1528_p7 = pnand %p1526_p6, %p1523_p5 }
 0xa74   :  { %1531 = shalt.err (!%p1528_p7)
}
 0xa75   :  { %990 = dma.vmem_to_hbm [thread:$0]  %s985_s23, 64, %s1985_s14, [#allocation25], %s1556_s26, %s1556_s26, %s1557_s19  }
 0xa76   :  { %1546 = dma.done.wait [#allocation4], 64  }
 0xa77   :  { %1547 = vsyncadd [#allocation4], 4294967232 }
 0xa78   :  { %1548 = dma.done.wait [#allocation25], 64  }
 0xa79   :  { %1549 = vsyncadd [#allocation25], 4294967232 }
 0xa7a   :  { %997 = vsyncpa [#allocation3], 1 }
 0xa7b   :  { %998 = vsyncpa [#allocation6], 1 }
 0xa7c   :  { %999 = vsyncpa [#allocation9], 1 }
 0xa7d   :  { %1000 = vsyncpa [#allocation12], 1 }
 0xa7e   :  { %1001 = vsyncpa [#allocation15], 1 }
 0xa7f   :  { %1002 = vsyncpa [#allocation18], 1 }
 0xa80   :  { %1003 = vsyncpa [#allocation21], 1 }
 0xa81   :  { %1004 = vsyncpa [#allocation4], 1 }
 0xa82   :  { %1005 = vsyncpa [#allocation25], 1 }

// kernel: topdown_core.1
= control target key start
LH: loop header
LB: loop body
LE: loop exit
PB: predicated region body
PF: predicated region fallthrough
CT: control target
= control target key end

     0   :  { %20 = vsyncpa [#allocation3], 0  ;;  %s1971_s0 = inlined_call_operand.hbm [shape: f32[2,32], index: 0, kind: input, shape index: {}]   ;;  %s1972_s1 = inlined_call_operand.hbm [shape: f32[2,32], index: 1, kind: input, shape index: {}]   ;;  %s1973_s2 = inlined_call_operand.hbm [shape: bf16[2,8,32], index: 2, kind: input, shape index: {}]   ;;  %s1974_s3 = inlined_call_operand.hbm [shape: bf16[2,8,32], index: 3, kind: input, shape index: {}]   ;;  %s1975_s4 = inlined_call_operand.hbm [shape: f32[2,2,32], index: 4, kind: input, shape index: {}, may-alias: {4,13}]   ;;  %s1976_s5 = inlined_call_operand.hbm [shape: f32[2,2,32], index: 5, kind: input, shape index: {}, may-alias: {5,14}]   ;;  %s1977_s6 = inlined_call_operand.hbm [shape: bf16[128,128], index: 6, kind: input, shape index: {}]   ;;  %s1978_s7 = inlined_call_operand.hbm [shape: f32[1,128], index: 7, kind: input, shape index: {}]   ;;  %s1979_s8 = inlined_call_operand.hbm [shape: bf16[32,32], index: 8, kind: input, shape index: {}]   ;;  %s1980_s9 = inlined_call_operand.hbm [shape: f32[1,32], index: 9, kind: input, shape index: {}]   ;;  %s1981_s10 = inlined_call_operand.hbm [shape: f32[1,32], index: 10, kind: input, shape index: {}]   ;;  %s1982_s11 = inlined_call_operand.hbm [shape: bf16[96,128], index: 11, kind: input, shape index: {}]   ;;  %s1983_s12 = inlined_call_operand.hbm [shape: f32[1,128], index: 12, kind: input, shape index: {}]   ;;  %s1984_s13 = inlined_call_operand.hbm [shape: f32[2,2,32], index: 13, kind: output, shape index: {0}, may-alias: {4,13}]   ;;  %s1985_s14 = inlined_call_operand.hbm [shape: f32[2,2,32], index: 14, kind: output, shape index: {1}, may-alias: {5,14}]  }
   0x1   :  { %21 = vsyncpa [#allocation6], 0 }
   0x2   :  { %22 = vsyncpa [#allocation9], 0 }
   0x3   :  { %23 = vsyncpa [#allocation12], 0 }
   0x4   :  { %24 = vsyncpa [#allocation15], 0 }
   0x5   :  { %25 = vsyncpa [#allocation18], 0 }
   0x6   :  { %26 = vsyncpa [#allocation21], 0 }
   0x7   :  { %27 = vsyncpa [#allocation4], 0 }
   0x8   :  { %28 = vsyncpa [#allocation25], 0  ;;  %s1550_s29 = smov [#allocation5]   ;;  %s1202_s17 = scalar_lea.hbm %s1972_s1, 32 }
   0x9   :  { %s45_s30 = sshll.u32 %s1550_s29, 4  ;;  %p1203_p0 = scmp.ne.s32.totalorder %s1972_s1, %s1202_s17  ;;  %s46_s30 = int_to_ptr.vmem [resolvable:$true] %s45_s30 }
   0xa   :  { %p1206_p1 = scmp.lt.u32.totalorder %s1202_s17, %s1972_s1 }
   0xc   :  { %p1208_p2 = pnand %p1206_p1, %p1203_p0 }
   0xe   :  { %1211 = shalt.err (!%p1208_p2)
}
   0xf   :  { %s1212_s22 = scalar_lea.vmem %s46_s30, 32  ;;  %p1217_p4 = scmp.lt.s32.totalorder %s46_s30, %s46_s30 }
  0x10   :  { %p1213_p3 = scmp.ne.s32.totalorder %s46_s30, %s1212_s22  ;;  %p1218_p5 = scmp.lt.s32.totalorder %s1212_s22, %s1212_s22 }
  0x12   :  { %p1219_p6 = por %p1218_p5, %p1217_p4 }
  0x14   :  { %p1220_p7 = pnand %p1219_p6, %p1213_p3 }
  0x16   :  { %1223 = shalt.err (!%p1220_p7)
}
  0x17   :  { %48 = dma.hbm_to_vmem [thread:$0]  %s1972_s1, 32, %s46_s30, [#allocation6]  }
  0x18   :  { %s1551_s25 = smov [#allocation8]   ;;  %s1224_s29 = scalar_lea.hbm %s1974_s3, 128 }
  0x19   :  { %s66_s26 = sshll.u32 %s1551_s25, 4  ;;  %p1225_p8 = scmp.ne.s32.totalorder %s1974_s3, %s1224_s29  ;;  %s67_s26 = int_to_ptr.vmem [resolvable:$true] %s66_s26 }
  0x1a   :  { %p1228_p9 = scmp.lt.u32.totalorder %s1224_s29, %s1974_s3 }
  0x1c   :  { %p1230_p10 = pnand %p1228_p9, %p1225_p8 }
  0x1e   :  { %1233 = shalt.err (!%p1230_p10)
}
  0x1f   :  { %s1234_s19 = scalar_lea.vmem %s67_s26, 128  ;;  %p1239_p12 = scmp.lt.s32.totalorder %s67_s26, %s67_s26 }
  0x20   :  { %p1235_p11 = scmp.ne.s32.totalorder %s67_s26, %s1234_s19  ;;  %p1240_p13 = scmp.lt.s32.totalorder %s1234_s19, %s1234_s19 }
  0x22   :  { %p1241_p0 = por %p1240_p13, %p1239_p12 }
  0x24   :  { %p1242_p1 = pnand %p1241_p0, %p1235_p11 }
  0x26   :  { %1245 = shalt.err (!%p1242_p1)
}
  0x27   :  { %s1552_s1 = smov 64   ;;  %s1553_s30 = smov 4  }
  0x28   :  { %72 = dma.hbm_to_vmem [thread:$0]  %s1974_s3, 128, %s67_s26, [#allocation9], %s1552_s1, %s1552_s1, %s1553_s30  }
  0x29   :  { %s1554_s22 = smov [#allocation11]   ;;  %s1555_s24 = smov [#allocation14]  }
  0x2a   :  { %s90_s23 = sshll.u32 %s1554_s22, 4  ;;  %s115_s25 = sshll.u32 %s1555_s24, 4  ;;  %s91_s23 = int_to_ptr.vmem [resolvable:$true] %s90_s23  ;;  %s1676_s25 = int_to_ptr.vmem [resolvable:$true] %s115_s25 }
  0x2b   :  { %s1246_s29 = scalar_lea.hbm %s1976_s5, 64 }
  0x2c   :  { %p1247_p2 = scmp.ne.s32.totalorder %s1976_s5, %s1246_s29  ;;  %p1250_p3 = scmp.lt.u32.totalorder %s1246_s29, %s1976_s5 }
  0x2e   :  { %p1252_p4 = pnand %p1250_p3, %p1247_p2 }
  0x30   :  { %1255 = shalt.err (!%p1252_p4)
}
  0x31   :  { %s1256_s3 = scalar_lea.vmem %s91_s23, 64  ;;  %p1261_p6 = scmp.lt.s32.totalorder %s91_s23, %s91_s23 }
  0x32   :  { %p1257_p5 = scmp.ne.s32.totalorder %s91_s23, %s1256_s3  ;;  %p1262_p7 = scmp.lt.s32.totalorder %s1256_s3, %s1256_s3 }
  0x34   :  { %p1263_p8 = por %p1262_p7, %p1261_p6 }
  0x36   :  { %p1264_p9 = pnand %p1263_p8, %p1257_p5 }
  0x38   :  { %1267 = shalt.err (!%p1264_p9)
}
  0x39   :  { %s1556_s26 = smov 32   ;;  %s1557_s19 = smov 2  }
  0x3a   :  { %96 = dma.hbm_to_vmem [thread:$0]  %s1976_s5, 64, %s91_s23, [#allocation12], %s1556_s26, %s1556_s26, %s1557_s19  }
  0x3b   :  { %s1268_s27 = scalar_lea.hbm %s1978_s7, 16 }
  0x3c   :  { %p1269_p10 = scmp.ne.s32.totalorder %s1978_s7, %s1268_s27  ;;  %p1272_p11 = scmp.lt.u32.totalorder %s1268_s27, %s1978_s7 }
  0x3e   :  { %p1274_p12 = pnand %p1272_p11, %p1269_p10 }
  0x40   :  { %1277 = shalt.err (!%p1274_p12)
}
  0x41   :  { %s1278_s17 = scalar_lea.vmem %s1676_s25, 16  ;;  %s1282_s5 = scalar_lea.vmem %s1676_s25, 32 }
  0x42   :  { %p1279_p13 = scmp.ne.s32.totalorder %s1676_s25, %s1278_s17  ;;  %p1283_p0 = scmp.lt.s32.totalorder %s1676_s25, %s1676_s25 }
  0x43   :  { %p1284_p1 = scmp.lt.s32.totalorder %s1282_s5, %s1278_s17 }
  0x45   :  { %p1285_p2 = por %p1284_p1, %p1283_p0 }
  0x47   :  { %p1286_p3 = pnand %p1285_p2, %p1279_p13 }
  0x49   :  { %1289 = shalt.err (!%p1286_p3)
}
  0x4a   :  { %118 = dma.hbm_to_vmem [thread:$0]  %s1978_s7, 16, %s1676_s25, [#allocation15]  }
  0x4b   :  { %s1558_s3 = smov [#allocation17]   ;;  %s1559_s21 = smov [#allocation20]  }
  0x4c   :  { %s137_s20 = sshll.u32 %s1558_s3, 4  ;;  %s156_s22 = sshll.u32 %s1559_s21, 4  ;;  %s138_s20 = int_to_ptr.vmem [resolvable:$true] %s137_s20  ;;  %s1711_s22 = int_to_ptr.vmem [resolvable:$true] %s156_s22 }
  0x4d   :  { %s1290_s28 = scalar_lea.hbm %s1980_s9, 16 }
  0x4e   :  { %p1291_p4 = scmp.ne.s32.totalorder %s1980_s9, %s1290_s28  ;;  %p1294_p5 = scmp.lt.u32.totalorder %s1290_s28, %s1980_s9 }
  0x50   :  { %p1296_p6 = pnand %p1294_p5, %p1291_p4 }
  0x52   :  { %1299 = shalt.err (!%p1296_p6)
}
  0x53   :  { %s1300_s7 = scalar_lea.vmem %s138_s20, 16  ;;  %s1304_s25 = scalar_lea.vmem %s138_s20, 32 }
  0x54   :  { %p1301_p7 = scmp.ne.s32.totalorder %s138_s20, %s1300_s7  ;;  %p1305_p8 = scmp.lt.s32.totalorder %s138_s20, %s138_s20 }
  0x55   :  { %p1306_p9 = scmp.lt.s32.totalorder %s1304_s25, %s1300_s7 }
  0x57   :  { %p1307_p10 = por %p1306_p9, %p1305_p8 }
  0x59   :  { %p1308_p11 = pnand %p1307_p10, %p1301_p7 }
  0x5b   :  { %1311 = shalt.err (!%p1308_p11)
}
  0x5c   :  { %140 = dma.hbm_to_vmem [thread:$0]  %s1980_s9, 16, %s138_s20, [#allocation18]  }
  0x5d   :  { %s1312_s21 = scalar_lea.hbm %s1982_s11, 768 }
  0x5e   :  { %p1313_p12 = scmp.ne.s32.totalorder %s1982_s11, %s1312_s21  ;;  %p1316_p13 = scmp.lt.u32.totalorder %s1312_s21, %s1982_s11 }
  0x60   :  { %p1318_p0 = pnand %p1316_p13, %p1313_p12 }
  0x62   :  { %1321 = shalt.err (!%p1318_p0)
}
  0x63   :  { %s1322_s15 = scalar_lea.vmem %s1711_s22, 768  ;;  %p1327_p2 = scmp.lt.s32.totalorder %s1711_s22, %s1711_s22 }
  0x64   :  { %p1323_p1 = scmp.ne.s32.totalorder %s1711_s22, %s1322_s15  ;;  %p1328_p3 = scmp.lt.s32.totalorder %s1322_s15, %s1322_s15 }
  0x66   :  { %p1329_p4 = por %p1328_p3, %p1327_p2 }
  0x68   :  { %p1330_p5 = pnand %p1329_p4, %p1323_p1 }
  0x6a   :  { %1333 = shalt.err (!%p1330_p5)
}
  0x6b   :  { %162 = dma.hbm_to_vmem [thread:$0]  %s1982_s11, 768, %s1711_s22, [#allocation21], %s1552_s1, %s1552_s1, %s1553_s30  }
  0x6c   :  { %s1560_s16 = smov [#allocation2]   ;;  %s1561_s7 = smov [#allocation7]  }
  0x6d   :  { %s35_s17 = sshll.u32 %s1560_s16, 4  ;;  %s54_s25 = sshll.u32 %s1561_s7, 4  ;;  %s36_s17 = int_to_ptr.vmem [resolvable:$true] %s35_s17  ;;  %s1745_s25 = int_to_ptr.vmem [resolvable:$true] %s54_s25 }
  0x6e   :  { %s1334_s18 = scalar_lea.hbm %s1971_s0, 32 }
  0x6f   :  { %p1335_p6 = scmp.ne.s32.totalorder %s1971_s0, %s1334_s18  ;;  %p1338_p7 = scmp.lt.u32.totalorder %s1334_s18, %s1971_s0 }
  0x71   :  { %p1340_p8 = pnand %p1338_p7, %p1335_p6 }
  0x73   :  { %1343 = shalt.err (!%p1340_p8)
}
  0x74   :  { %s1344_s11 = scalar_lea.vmem %s36_s17, 32  ;;  %p1349_p10 = scmp.lt.s32.totalorder %s36_s17, %s36_s17 }
  0x75   :  { %p1345_p9 = scmp.ne.s32.totalorder %s36_s17, %s1344_s11  ;;  %p1350_p11 = scmp.lt.s32.totalorder %s1344_s11, %s1344_s11 }
  0x77   :  { %p1351_p12 = por %p1350_p11, %p1349_p10 }
  0x79   :  { %p1352_p13 = pnand %p1351_p12, %p1345_p9 }
  0x7b   :  { %1355 = shalt.err (!%p1352_p13)
}
  0x7c   :  { %38 = dma.hbm_to_vmem [thread:$0]  %s1971_s0, 32, %s36_s17, [#allocation3]  }
  0x7d   :  { %s1356_s9 = scalar_lea.hbm %s1973_s2, 128 }
  0x7e   :  { %p1357_p0 = scmp.ne.s32.totalorder %s1973_s2, %s1356_s9  ;;  %p1360_p1 = scmp.lt.u32.totalorder %s1356_s9, %s1973_s2 }
  0x80   :  { %p1362_p2 = pnand %p1360_p1, %p1357_p0 }
  0x82   :  { %1365 = shalt.err (!%p1362_p2)
}
  0x83   :  { %s1366_s23 = scalar_lea.vmem %s1745_s25, 128  ;;  %p1371_p4 = scmp.lt.s32.totalorder %s1745_s25, %s1745_s25 }
  0x84   :  { %p1367_p3 = scmp.ne.s32.totalorder %s1745_s25, %s1366_s23  ;;  %p1372_p5 = scmp.lt.s32.totalorder %s1366_s23, %s1366_s23 }
  0x86   :  { %p1373_p6 = por %p1372_p5, %p1371_p4 }
  0x88   :  { %p1374_p7 = pnand %p1373_p6, %p1367_p3 }
  0x8a   :  { %1377 = shalt.err (!%p1374_p7)
}
  0x8b   :  { %60 = dma.hbm_to_vmem [thread:$0]  %s1973_s2, 128, %s1745_s25, [#allocation6], %s1552_s1, %s1552_s1, %s1553_s30  }
  0x8c   :  { %s1562_s18 = smov [#allocation10]   ;;  %s1563_s21 = smov [#allocation13]  }
  0x8d   :  { %s78_s3 = sshll.u32 %s1562_s18, 4  ;;  %s102_s24 = sshll.u32 %s1563_s21, 4  ;;  %s79_s3 = int_to_ptr.vmem [resolvable:$true] %s78_s3  ;;  %s1779_s24 = int_to_ptr.vmem [resolvable:$true] %s102_s24 }
  0x8e   :  { %s1378_s22 = scalar_lea.hbm %s1975_s4, 64 }
  0x8f   :  { %p1379_p8 = scmp.ne.s32.totalorder %s1975_s4, %s1378_s22  ;;  %p1382_p9 = scmp.lt.u32.totalorder %s1378_s22, %s1975_s4 }
  0x91   :  { %p1384_p10 = pnand %p1382_p9, %p1379_p8 }
  0x93   :  { %1387 = shalt.err (!%p1384_p10)
}
  0x94   :  { %s1388_s2 = scalar_lea.vmem %s79_s3, 64  ;;  %p1393_p12 = scmp.lt.s32.totalorder %s79_s3, %s79_s3 }
  0x95   :  { %p1389_p11 = scmp.ne.s32.totalorder %s79_s3, %s1388_s2  ;;  %p1394_p13 = scmp.lt.s32.totalorder %s1388_s2, %s1388_s2 }
  0x97   :  { %p1395_p0 = por %p1394_p13, %p1393_p12 }
  0x99   :  { %p1396_p1 = pnand %p1395_p0, %p1389_p11 }
  0x9b   :  { %1399 = shalt.err (!%p1396_p1)
}
  0x9c   :  { %84 = dma.hbm_to_vmem [thread:$0]  %s1975_s4, 64, %s79_s3, [#allocation9], %s1556_s26, %s1556_s26, %s1557_s19  }
  0x9d   :  { %s1400_s5 = scalar_lea.hbm %s1977_s6, 1024 }
  0x9e   :  { %p1401_p2 = scmp.ne.s32.totalorder %s1977_s6, %s1400_s5  ;;  %p1404_p3 = scmp.lt.u32.totalorder %s1400_s5, %s1977_s6 }
  0xa0   :  { %p1406_p4 = pnand %p1404_p3, %p1401_p2 }
  0xa2   :  { %1409 = shalt.err (!%p1406_p4)
}
  0xa3   :  { %s1410_s21 = scalar_lea.vmem %s1779_s24, 1024  ;;  %p1415_p6 = scmp.lt.s32.totalorder %s1779_s24, %s1779_s24 }
  0xa4   :  { %p1411_p5 = scmp.ne.s32.totalorder %s1779_s24, %s1410_s21  ;;  %p1416_p7 = scmp.lt.s32.totalorder %s1410_s21, %s1410_s21 }
  0xa6   :  { %p1417_p8 = por %p1416_p7, %p1415_p6 }
  0xa8   :  { %p1418_p9 = pnand %p1417_p8, %p1411_p5 }
  0xaa   :  { %1421 = shalt.err (!%p1418_p9)
}
  0xab   :  { %108 = dma.hbm_to_vmem [thread:$0]  %s1977_s6, 1024, %s1779_s24, [#allocation12], %s1552_s1, %s1552_s1, %s1553_s30  }
  0xac   :  { %s1564_s27 = smov [#allocation16]   ;;  %s1565_s22 = smov [#allocation19]  }
  0xad   :  { %s124_s11 = sshll.u32 %s1564_s27, 4  ;;  %s147_s28 = sshll.u32 %s1565_s22, 4  ;;  %s125_s11 = int_to_ptr.vmem [resolvable:$true] %s124_s11  ;;  %s148_s28 = int_to_ptr.vmem [resolvable:$true] %s147_s28 }
  0xae   :  { %s1422_s9 = scalar_lea.hbm %s1979_s8, 256 }
  0xaf   :  { %p1423_p10 = scmp.ne.s32.totalorder %s1979_s8, %s1422_s9  ;;  %p1426_p11 = scmp.lt.u32.totalorder %s1422_s9, %s1979_s8 }
  0xb1   :  { %p1428_p12 = pnand %p1426_p11, %p1423_p10 }
  0xb3   :  { %1431 = shalt.err (!%p1428_p12)
}
  0xb4   :  { %s1432_s6 = scalar_lea.vmem %s125_s11, 256  ;;  %p1437_p0 = scmp.lt.s32.totalorder %s125_s11, %s125_s11 }
  0xb5   :  { %p1433_p13 = scmp.ne.s32.totalorder %s125_s11, %s1432_s6  ;;  %p1438_p1 = scmp.lt.s32.totalorder %s1432_s6, %s1432_s6 }
  0xb7   :  { %p1439_p2 = por %p1438_p1, %p1437_p0 }
  0xb9   :  { %p1440_p3 = pnand %p1439_p2, %p1433_p13 }
  0xbb   :  { %1443 = shalt.err (!%p1440_p3)
}
  0xbc   :  { %130 = dma.hbm_to_vmem [thread:$0]  %s1979_s8, 256, %s125_s11, [#allocation15], %s1552_s1, %s1552_s1, %s1553_s30  }
  0xbd   :  { %s1444_s0 = scalar_lea.hbm %s1981_s10, 16 }
  0xbe   :  { %p1445_p4 = scmp.ne.s32.totalorder %s1981_s10, %s1444_s0  ;;  %p1448_p5 = scmp.lt.u32.totalorder %s1444_s0, %s1981_s10 }
  0xc0   :  { %p1450_p6 = pnand %p1448_p5, %p1445_p4 }
  0xc2   :  { %1453 = shalt.err (!%p1450_p6)
}
  0xc3   :  { %s1454_s3 = scalar_lea.vmem %s148_s28, 16  ;;  %s1458_s27 = scalar_lea.vmem %s148_s28, 32 }
  0xc4   :  { %p1455_p7 = scmp.ne.s32.totalorder %s148_s28, %s1454_s3  ;;  %p1459_p8 = scmp.lt.s32.totalorder %s148_s28, %s148_s28 }
  0xc5   :  { %p1460_p9 = scmp.lt.s32.totalorder %s1458_s27, %s1454_s3 }
  0xc7   :  { %p1461_p10 = por %p1460_p9, %p1459_p8 }
  0xc9   :  { %p1462_p11 = pnand %p1461_p10, %p1455_p7 }
  0xcb   :  { %1465 = shalt.err (!%p1462_p11)
}
  0xcc   :  { %150 = dma.hbm_to_vmem [thread:$0]  %s1981_s10, 16, %s148_s28, [#allocation18]  }
  0xcd   :  { %s1566_s11 = smov [#allocation22]   ;;  %s1466_s9 = scalar_lea.hbm %s1983_s12, 16 }
  0xce   :  { %s169_s22 = sshll.u32 %s1566_s11, 4  ;;  %p1467_p12 = scmp.ne.s32.totalorder %s1983_s12, %s1466_s9  ;;  %s170_s22 = int_to_ptr.vmem [resolvable:$true] %s169_s22 }
  0xcf   :  { %p1470_p13 = scmp.lt.u32.totalorder %s1466_s9, %s1983_s12 }
  0xd1   :  { %p1472_p0 = pnand %p1470_p13, %p1467_p12 }
  0xd3   :  { %1475 = shalt.err (!%p1472_p0)
}
  0xd4   :  { %s1476_s6 = scalar_lea.vmem %s170_s22, 16  ;;  %s1480_s10 = scalar_lea.vmem %s170_s22, 32 }
  0xd5   :  { %p1477_p1 = scmp.ne.s32.totalorder %s170_s22, %s1476_s6  ;;  %p1481_p2 = scmp.lt.s32.totalorder %s170_s22, %s170_s22 }
  0xd6   :  { %p1482_p3 = scmp.lt.s32.totalorder %s1480_s10, %s1476_s6 }
  0xd8   :  { %p1483_p4 = por %p1482_p3, %p1481_p2 }
  0xda   :  { %p1484_p5 = pnand %p1483_p4, %p1477_p1 }
  0xdc   :  { %1487 = shalt.err (!%p1484_p5)
}
  0xdd   :  { %172 = dma.hbm_to_vmem [thread:$0]  %s1983_s12, 16, %s170_s22, [#allocation21]  }
  0xde   :  { %1532 = dma.done.wait [#allocation3], 32  }
  0xdf   :  { %1533 = vsyncadd [#allocation3], 4294967264 }
  0xe0   :  { %1534 = dma.done.wait [#allocation6], 160  }
  0xe1   :  { %1535 = vsyncadd [#allocation6], 4294967136 }
  0xe2   :  { %1536 = dma.done.wait [#allocation9], 192  }
  0xe3   :  { %1537 = vsyncadd [#allocation9], 4294967104 }
  0xe4   :  { %1538 = dma.done.wait [#allocation12], 1088  }
  0xe5   :  { %1539 = vsyncadd [#allocation12], 4294966208 }
  0xe6   :  { %1540 = dma.done.wait [#allocation15], 272  }
  0xe7   :  { %1541 = vsyncadd [#allocation15], 4294967024 }
  0xe8   :  { %1542 = dma.done.wait [#allocation18], 32  }
  0xe9   :  { %1543 = vsyncadd [#allocation18], 4294967264 }
  0xea   :  { %1544 = dma.done.wait [#allocation21], 784  }
  0xeb   :  { %1545 = vsyncadd [#allocation21], 4294966512  ;;  %v1567_v0 = vmov 0.0   ;;  %vm1568_vm0 = vmmov 0   ;;  %v1158_v1 = vld [vmem:[#allocation13 + $0x10] sm:$0xff]   ;;  %v1159_v2 = vld [vmem:[#allocation13] sm:$0xff]   ;;  %v578_v61 = vlaneseq }
  0xec   :  { %1068 = vmatprep.subr.bf16.mxu0 %v1567_v0  ;;  %1076 = vmatprep.subr.bf16.mxu1 %v1567_v0  ;;  %v1160_v3 = vld [vmem:[#allocation13 + $0x18] sm:$0xff]   ;;  %v1161_v4 = vld [vmem:[#allocation13 + $0x8] sm:$0xff]   ;;  %v224_v5 = vld [vmem:[#allocation5] sm:$0x3]  ;;  %vm242_vm1 = vcmask 261120   ;;  %vm638_vm2 = vcmask 1041409  }
  0xed   :  { %1072 = vmatprep.mubr.msk.bf16.mxu0 %vm1568_vm0, %v1567_v0  ;;  %1080 = vmatprep.mubr.msk.bf16.mxu1 %vm1568_vm0, %v1567_v0  ;;  %v215_v6 = vld [vmem:[#allocation10 + $0x2] sm:$0x3]  ;;  %v225_v7 = vpack.c.bf16 %v224_v5, %v224_v5  ;;  %v1162_v9 = vld [vmem:[#allocation13 + $0x20] sm:$0xff]   ;;  %v1163_v10 = vld [vmem:[#allocation13 + $0x30] sm:$0xff]   ;;  %v1569_v59 = vmov 1966171168  }
  0xee   :  { %1069 = vmatpush3.bf16.msra.mxu0 %v1158_v1  ;;  %1077 = vmatpush3.bf16.msra.mxu1 %v1159_v2  ;;  %v1863_v8 = vpack.c.bf16 %v215_v6, %v215_v6  ;;  %v1164_v11 = vld [vmem:[#allocation13 + $0x28] sm:$0xff]   ;;  %v341_v12 = vld [vmem:[#allocation2] sm:$0x3]  ;;  %v1165_v13 = vld [vmem:[#allocation13 + $0x38] sm:$0xff]   ;;  %v576_v60 = vunpack.c.l.s4 %v1569_v59  ;;  %v1906_v63 = vshrl.u32 %v578_v61, 7  ;;  %vm641_vm3 = vcmask 58368  }
  0xef   :  { %1070 = vmatprep.subr.bf16.mxu0 %v1567_v0  ;;  %1078 = vmatprep.subr.bf16.mxu1 %v1567_v0  ;;  %v213_v14 = vld [vmem:[#allocation10] sm:$0x3]  ;;  %v342_v15 = vpack.c.bf16 %v341_v12, %v341_v12  ;;  %v1018_v30 = vld [vmem:[#allocation14] ss:$0 sm:$0xff]  ;;  %v216_v39 = vld [vmem:[#allocation11] sm:$0x3] }
  0xf0   :  { %v403_v16 = vpack.c.bf16 %v213_v14, %v213_v14  ;;  %v1166_v50 = vld [vmem:[#allocation16] sm:$0xff]   ;;  %v1168_v52 = vld [vmem:[#allocation16 + $0x8] sm:$0xff]   ;;  %v577_v62 = vunpack.c.0.s8 %v576_v60  ;;  %v1020_v1 = vld [vmem:[#allocation17] ss:$0 sm:$0xff]  ;;  %s1571_s12 = smov 96   ;;  %vm948_vm4 = vcmask 254976  }
  0xf1   :  { %v1167_v51 = vld [vmem:[#allocation20 + $0x10] sm:$0xff]   ;;  %v1169_v53 = vld [vmem:[#allocation20 + $0x18] sm:$0xff]   ;;  %s1572_s7 = smov [#allocation23]   ;;  %s1573_s5 = smov [#allocation24]  }
  0xf2   :  { %1071 = vmatpush3.bf16.msra.mxu0 %v1160_v3  ;;  %1079 = vmatpush3.bf16.msra.mxu1 %v1161_v4  ;;  %v580_v2 = vsub.s32 %v577_v62, %v1906_v63  ;;  %s984_s23 = sshll.u32 %s1573_s5, 4  ;;  %s985_s23 = int_to_ptr.vmem [resolvable:$true] %s984_s23 }
  0xf3   :  { %1084 = vmatprep.subr.bf16.mxu0 %v1567_v0  ;;  %1092 = vmatprep.subr.bf16.mxu1 %v1567_v0 }
  0xf5   :  { %1073 = vmatmul.mubr.msk.bf16.vlgmr.msra.gmra.mrb[0].mxu0 %vm242_vm1, %v225_v7  ;;  %1081 = vmatmul.mubr.msk.bf16.vlgmr.msra.gmra.mrb[0].mxu1 %vm242_vm1, %v1863_v8 }
  0xf6   :  { %1085 = vmatpush3.bf16.msra.mxu0 %v1162_v9  ;;  %1093 = vmatpush3.bf16.msra.mxu1 %v1163_v10  ;;  %v1037_v9 = vld [vmem:[#allocation8] sm:$0xff]  }
  0xf7   :  { %1086 = vmatprep.subr.bf16.mxu0 %v1567_v0  ;;  %1094 = vmatprep.subr.bf16.mxu1 %v1567_v0 }
  0xf8   :  { %1088 = vmatprep.mubr.msk.bf16.mxu0 %vm1568_vm0, %v1567_v0  ;;  %1096 = vmatprep.mubr.msk.bf16.mxu1 %vm1568_vm0, %v1567_v0 }
  0xfa   :  { %1087 = vmatpush3.bf16.msra.mxu0 %v1164_v11  ;;  %1095 = vmatpush3.bf16.msra.mxu1 %v1165_v13  ;;  %v599_v13 = vsub.s32 0, %v1906_v63 }
  0xfb   :  { %1100 = vmatprep.subr.bf16.mxu0 %v1567_v0  ;;  %1108 = vmatprep.subr.bf16.mxu1 %v1567_v0 }
  0xfd   :  { %1089 = vmatmul.mubr.msk.bf16.vlgmr.msra.gmra.mrb[4].mxu0 %vm242_vm1, %v342_v15  ;;  %1097 = vmatmul.mubr.msk.bf16.vlgmr.msra.gmra.mrb[4].mxu1 %vm242_vm1, %v403_v16  ;;  %v1038_v16 = vunpack.c.l.bf16 %v1037_v9 }
  0xfe   :  { %1104 = vmatprep.mubr.msk.bf16.mxu0 %vm1568_vm0, %v1567_v0  ;;  %1112 = vmatprep.mubr.msk.bf16.mxu1 %vm1568_vm0, %v1567_v0 }
  0xff   :  { %1101 = vmatpush3.bf16.msra.mxu0 %v1166_v50  ;;  %1109 = vmatpush3.bf16.msra.mxu1 %v1167_v51 }
 0x100   :  { %1102 = vmatprep.subr.bf16.mxu0 %v1567_v0  ;;  %1110 = vmatprep.subr.bf16.mxu1 %v1567_v0 }
 0x103   :  { %1103 = vmatpush3.bf16.msra.mxu0 %v1168_v52  ;;  %1111 = vmatpush3.bf16.msra.mxu1 %v1169_v53 }
 0x104   :  { %1116 = vmatprep.subr.bf16.mxu0 %v1567_v0  ;;  %1124 = vmatprep.subr.bf16.mxu1 %v1567_v0 }
 0x1c8   :  { %v280_v17 = vpop.f32.mrb[0].mxu0  ;;  %v335_v18 = vpop.f32.mrb[0].mxu1 }
 0x1c9   :  { %v1074_v19 = vpop.f32.mrb[1].mxu0  ;;  %v336_v20 = vadd.f32 %v335_v18, %v280_v17  ;;  %v1082_v21 = vpop.f32.mrb[1].mxu1 }
 0x1ca   :  { %v283_v22 = vpop.f32.mrb[2].mxu0  ;;  %v338_v23 = vpop.f32.mrb[2].mxu1  ;;  %v1039_v19 = vunpack.c.h.bf16 %v1037_v9  ;;  %v218_v9 = vld [vmem:[#allocation11 + $0x2] sm:$0x3] }
 0x1cb   :  { %v1075_v24 = vpop.f32.mrb[3].mxu0  ;;  %v1083_v25 = vpop.f32.mrb[3].mxu1 }
 0x1cc   :  { %v1024_v25 = vld [vmem:[#allocation19] ss:$0 sm:$0xff] }
 0x1d0   :  { %v396_v26 = vpop.f32.mrb[4].mxu0  ;;  %v457_v28 = vpop.f32.mrb[4].mxu1 }
 0x1d1   :  { %v402_v27 = vadd.f32 %v396_v26, %v336_v20  ;;  %v1090_v29 = vpop.f32.mrb[5].mxu0  ;;  %v1098_v31 = vpop.f32.mrb[5].mxu1 }
 0x1d2   :  { %v399_v32 = vpop.f32.mrb[6].mxu0  ;;  %v460_v34 = vpop.f32.mrb[6].mxu1 }
 0x1d3   :  { %v463_v33 = vadd.f32 %v457_v28, %v402_v27  ;;  %v1091_v35 = vpop.f32.mrb[7].mxu0  ;;  %v1099_v36 = vpop.f32.mrb[7].mxu1  ;;  %v629_v32 = vand.u32 127, %v578_v61 }
 0x1d5   :  { %v471_v37 = vadd.f32 %v1018_v30, %v463_v33  ;;  %v632_v33 = vsub.s32 %v629_v32, %v1906_v63 }
 0x1d7   :  { %1174 = vtanh.f32 %v471_v37  ;;  %v1019_v40 = vmul.f32 -1.442695, %v471_v37 }
 0x1d9   :  { %1176 = vpow2.f32 %v1019_v40  ;;  %v1570_v40 = vmov 0  }
 0x1da   :  { %1157 = vset.pattern.permute.xlu0 %v1570_v40  ;;  %1156 = vset.pattern.permute.xlu1 %v1570_v40 }
 0x1e1   :  { %v1175_v38 = vpop.eup %1174 }
 0x1e2   :  { %485 = vrot.lane.b32.xlu0 %v1175_v38, %s1552_s1 }
 0x1e3   :  { %v1177_v41 = vpop.eup %1176 }
 0x1e4   :  { %v475_v42 = vadd.f32 1.0, %v1177_v41  ;;  %v652_v41 = vsub.s32 1, %v1906_v63 }
 0x1e6   :  { %480 = vrot.lane.b32.xlu0 %v216_v39, %s1556_s26  ;;  %1178 = vrcp.f32 %v475_v42 }
 0x1f0   :  { %v1179_v43 = vpop.eup %1178 }
 0x254   :  { %v486_v44 = vpop.permute.xlu0 %485 }
 0x255   :  { %v488_v45 = vmul.f32 %v1179_v43, %v486_v44 }
 0x257   :  { %490 = vrot.lane.b32.xlu1 %v488_v45, %s1556_s26 }
 0x258   :  { %v481_v46 = vpop.permute.xlu0 %480 }
 0x259   :  { %v483_v47 = vmul.f32 %v1179_v43, %v481_v46 }
 0x2c9   :  { %v491_v48 = vpop.permute.xlu1 %490 }
 0x2ca   :  { %v1887_v49 = vadd.f32 %v491_v48, %v483_v47 }
 0x2cc   :  { %1180 = vtanh.f32 %v1887_v49 }
 0x2d6   :  { %v1181_v54 = vpop.eup %1180 }
 0x2d7   :  { %496 = vrot.lane.b32.xlu1 %v1181_v54, %s1552_s1 }
 0x349   :  { %v497_v55 = vpop.permute.xlu1 %496 }
 0x34a   :  { %v1895_v56 = vmul.f32 %v1179_v43, %v497_v55 }
 0x34c   :  { %v500_v57 = vpack.c.bf16 %v1895_v56, %v1895_v56 }
 0x34e   :  { %513 = vrot.lane.b32.xlu0 %v500_v57, %s1556_s26 }
 0x3c0   :  { %v514_v58 = vpop.permute.xlu0 %513 }
 0x3c1   :  { %1105 = vmatmul.mubr.msk.bf16.vlgmr.msra.gmra.mrb[8].mxu0 %vm242_vm1, %v514_v58  ;;  %1113 = vmatmul.mubr.msk.bf16.vlgmr.msra.gmra.mrb[8].mxu1 %vm242_vm1, %v514_v58 }
 0x3c2   :  { %1120 = vmatprep.mubr.msk.bf16.mxu0 %vm1568_vm0, %v1567_v0  ;;  %1128 = vmatprep.mubr.msk.bf16.mxu1 %vm1568_vm0, %v1567_v0 }
 0x494   :  { %v564_v3 = vpop.f32.mrb[8].mxu0  ;;  %v1909_v4 = vpop.f32.mrb[8].mxu1 }
 0x495   :  { %v565_v5 = vadd.f32 %v1020_v1, %v564_v3  ;;  %v1106_v6 = vpop.f32.mrb[9].mxu0  ;;  %v1114_v7 = vpop.f32.mrb[9].mxu1  ;;  %v1171_v3 = vld [vmem:[#allocation20 + $0x20] sm:$0xff]  }
 0x496   :  { %v567_v10 = vpop.f32.mrb[10].mxu0  ;;  %v787_v11 = vpop.f32.mrb[10].mxu1  ;;  %1125 = vmatpush3.bf16.msra.mxu1 %v1171_v3  ;;  %v1172_v6 = vld [vmem:[#allocation20 + $0x8] sm:$0xff]  }
 0x497   :  { %v581_v12 = vrot.slane %v565_v5, %v580_v2  ;;  %v1107_v14 = vpop.f32.mrb[11].mxu0  ;;  %v1115_v15 = vpop.f32.mrb[11].mxu1  ;;  %v1170_v5 = vld [vmem:[#allocation20] sm:$0xff]   ;;  %1126 = vmatprep.subr.bf16.mxu1 %v1567_v0  ;;  %v1173_v7 = vld [vmem:[#allocation20 + $0x28] sm:$0xff]   ;;  %v1041_v10 = vld [vmem:[#allocation7] sm:$0xff]  }
 0x498   :  { %1117 = vmatpush3.bf16.msra.mxu0 %v1170_v5  ;;  %v1042_v11 = vunpack.c.l.bf16 %v1041_v10  ;;  %v1043_v14 = vunpack.c.h.bf16 %v1041_v10 }
 0x499   :  { %v582_v17 = vcombine.high %v581_v12, %v581_v12  ;;  %v589_v18 = vrot.slane %v581_v12, %v580_v2  ;;  %1118 = vmatprep.subr.bf16.mxu0 %v1567_v0 }
 0x49a   :  { %1127 = vmatpush3.bf16.msra.mxu1 %v1173_v7 }
 0x49b   :  { %v596_v20 = vrot.slane %v582_v17, %v580_v2  ;;  %v600_v21 = vrot.slane %v589_v18, %v599_v13 }
 0x49c   :  { %1119 = vmatpush3.bf16.msra.mxu0 %v1172_v6 }
 0x49d   :  { %v604_v22 = vrot.slane %v596_v20, %v599_v13  ;;  %v607_v23 = vadd.f32 %v1038_v16, %v600_v21  ;;  %1129 = vmatmul.mubr.msk.bf16.vlgmr.msra.gmra.mrb[12].mxu1 %vm242_vm1, %v1863_v8 }
 0x49f   :  { %v608_v24 = vadd.f32 %v1039_v19, %v604_v22  ;;  %1182 = vtanh.f32 %v607_v23 }
 0x4a1   :  { %1184 = vtanh.f32 %v608_v24 }
 0x4a9   :  { %v1183_v26 = vpop.eup %1182 }
 0x4aa   :  { %v618_v27 = vmul.f32 %v1183_v26, %v1024_v25 }
 0x4ab   :  { %v1185_v28 = vpop.eup %1184 }
 0x4ac   :  { %v620_v29 = vsel %vm242_vm1, %v618_v27, 0.0  ;;  %v619_v30 = vmul.f32 %v1185_v28, %v1024_v25 }
 0x4ad   :  { %621 = vadd.xlane.f32.xlu1 %v620_v29 }
 0x4ae   :  { %v623_v31 = vsel %vm242_vm1, %v619_v30, 0.0 }
 0x4af   :  { %624 = vadd.xlane.f32.xlu0 %v623_v31 }
 0x53a   :  { %v622_v34 = vpop.xlane.xlu1 %621 }
 0x53b   :  { %v633_v36 = vrot.slane %v622_v34, %v632_v33 }
 0x53c   :  { %v625_v35 = vpop.xlane.xlu0 %624 }
 0x53d   :  { %v637_v37 = vrot.slane %v625_v35, %v632_v33 }
 0x53f   :  { %v639_v38 = vsel %vm638_vm2, %v637_v37, %v633_v36 }
 0x540   :  { %v642_v39 = vsel %vm641_vm3, %v639_v38, -inf }
 0x541   :  { %643 = vmax.xlane.f32.xlu0 %v642_v39 }
 0x5ce   :  { %v644_v42 = vpop.xlane.xlu0 %643 }
 0x5cf   :  { %v649_v43 = vrot.slane %v644_v42, %v599_v13  ;;  %v653_v44 = vrot.slane %v644_v42, %v652_v41  ;;  %v1034_v42 = vld [vmem:[#allocation22] ss:$0 sm:$0xff] }
 0x5d1   :  { %v656_v45 = vsub.f32 %v622_v34, %v649_v43  ;;  %v657_v46 = vsub.f32 %v625_v35, %v653_v44  ;;  %v901_v35 = vpop.f32.mrb[12].mxu1 }
 0x5d2   :  { %v1130_v36 = vpop.f32.mrb[13].mxu1 }
 0x5d3   :  { %v658_v47 = vmul.f32 1.442695, %v656_v45  ;;  %v660_v48 = vmul.f32 1.442695, %v657_v46  ;;  %v904_v37 = vpop.f32.mrb[14].mxu1 }
 0x5d4   :  { %v1131_v38 = vpop.f32.mrb[15].mxu1 }
 0x5d5   :  { %1186 = vpow2.f32 %v658_v47 }
 0x5d6   :  { %1188 = vpow2.f32 %v660_v48 }
 0x5df   :  { %v1187_v50 = vpop.eup %1186 }
 0x5e0   :  { %v1189_v51 = vpop.eup %1188  ;;  %665 = vperm.xlu1 %1156, %v1187_v50  }
 0x5e1   :  { %668 = vperm.xlu0 %1157, %v1189_v51  }
 0x65f   :  { %v666_v52 = vpop.permute.xlu1 %665 }
 0x660   :  { %v669_v53 = vpop.permute.xlu0 %668  ;;  %v673_v54 = vrot.slane %v666_v52, %v632_v33 }
 0x661   :  { %v677_v55 = vrot.slane %v669_v53, %v632_v33 }
 0x663   :  { %v678_v57 = vsel %vm638_vm2, %v677_v55, %v673_v54 }
 0x664   :  { %v680_v58 = vsel %vm641_vm3, %v678_v57, 0.0 }
 0x665   :  { %681 = vadd.xlane.f32.xlu1 %v680_v58 }
 0x6f2   :  { %v682_v59 = vpop.xlane.xlu1 %681 }
 0x6f3   :  { %v687_v60 = vrot.slane %v682_v59, %v599_v13  ;;  %v691_v61 = vrot.slane %v682_v59, %v652_v41 }
 0x6f5   :  { %1190 = vrcp.f32 %v687_v60 }
 0x6f6   :  { %1192 = vrcp.f32 %v691_v61 }
 0x6ff   :  { %v1191_v62 = vpop.eup %1190 }
 0x700   :  { %v695_v63 = vmul.f32 %v1191_v62, %v1187_v50  ;;  %v1193_v1 = vpop.eup %1192 }
 0x701   :  { %v697_v2 = vmul.f32 %v1193_v1, %v1189_v51 }
 0x702   :  { %704 = vperm.xlu0 %1157, %v695_v63  }
 0x706   :  { %709 = vperm.xlu0 %1157, %v697_v2  }
 0x70a   :  { %924 = vrot.lane.b32.xlu0 %v218_v9, %s1556_s26 }
 0x781   :  { %v705_v12 = vpop.permute.xlu0 %704 }
 0x782   :  { %v712_v13 = vmul.f32 %v1042_v11, %v705_v12 }
 0x784   :  { %v714_v15 = vsel %vm242_vm1, %v712_v13, 0.0 }
 0x785   :  { %v715_v16 = vrot.slane %v714_v15, 4  ;;  %v710_v17 = vpop.permute.xlu0 %709 }
 0x786   :  { %v713_v0 = vmul.f32 %v1043_v14, %v710_v17 }
 0x787   :  { %v716_v18 = vadd.f32 %v715_v16, %v714_v15 }
 0x788   :  { %v721_v19 = vsel %vm242_vm1, %v713_v0, 0.0 }
 0x789   :  { %v717_v20 = vrot.slane %v716_v18, 2  ;;  %v722_v21 = vrot.slane %v721_v19, 4 }
 0x78b   :  { %v718_v22 = vadd.f32 %v717_v20, %v716_v18  ;;  %v723_v8 = vadd.f32 %v722_v21, %v721_v19 }
 0x78d   :  { %v719_v23 = vrot.slane %v718_v22, 1  ;;  %v724_v24 = vrot.slane %v723_v8, 2 }
 0x78f   :  { %v720_v25 = vadd.f32 %v719_v23, %v718_v22  ;;  %v725_v26 = vadd.f32 %v724_v24, %v723_v8 }
 0x791   :  { %v726_v27 = vrot.slane %v725_v26, 1  ;;  %v728_v28 = vpack.c.bf16 %v720_v25, %v720_v25 }
 0x793   :  { %v727_v29 = vadd.f32 %v726_v27, %v725_v26  ;;  %v792_v31 = vunpack.c.l.b16 %v728_v28 }
 0x795   :  { %v729_v30 = vpack.c.bf16 %v727_v29, %v727_v29 }
 0x797   :  { %v793_v32 = vunpack.c.l.b16 %v729_v30 }
 0x799   :  { %v794_v33 = vsel %vm638_vm2, %v793_v32, %v792_v31 }
 0x79a   :  { %v795_v34 = vpack.c.b16 %v794_v33, %v794_v33 }
 0x79c   :  { %1121 = vmatmul.mubr.msk.bf16.vlgmr.msra.gmra.mrb[12].mxu0 %vm242_vm1, %v795_v34 }
 0x86f   :  { %v845_v39 = vpop.f32.mrb[12].mxu0 }
 0x870   :  { %v846_v40 = vadd.f32 %v845_v39, %v1909_v4  ;;  %v1122_v41 = vpop.f32.mrb[13].mxu0  ;;  %v925_v4 = vpop.permute.xlu0 %924 }
 0x871   :  { %v848_v43 = vpop.f32.mrb[14].mxu0 }
 0x872   :  { %v907_v44 = vadd.f32 %v901_v35, %v846_v40  ;;  %v1123_v45 = vpop.f32.mrb[15].mxu0 }
 0x874   :  { %v915_v46 = vadd.f32 %v1034_v42, %v907_v44 }
 0x876   :  { %1194 = vtanh.f32 %v915_v46  ;;  %v1035_v48 = vmul.f32 -1.442695, %v915_v46 }
 0x878   :  { %1196 = vpow2.f32 %v1035_v48 }
 0x880   :  { %v1195_v47 = vpop.eup %1194 }
 0x881   :  { %929 = vrot.lane.b32.xlu1 %v1195_v47, %s1552_s1 }
 0x882   :  { %v1197_v50 = vpop.eup %1196 }
 0x883   :  { %v919_v51 = vadd.f32 1.0, %v1197_v50 }
 0x885   :  { %1198 = vrcp.f32 %v919_v51 }
 0x88f   :  { %v1199_v52 = vpop.eup %1198 }
 0x890   :  { %v927_v55 = vmul.f32 %v1199_v52, %v925_v4 }
 0x8f3   :  { %v930_v53 = vpop.permute.xlu1 %929 }
 0x8f4   :  { %v932_v54 = vmul.f32 %v1199_v52, %v930_v53 }
 0x8f6   :  { %934 = vrot.lane.b32.xlu0 %v932_v54, %s1556_s26 }
 0x968   :  { %v935_v57 = vpop.permute.xlu0 %934 }
 0x969   :  { %v937_v58 = vadd.f32 %v935_v57, %v927_v55 }
 0x96b   :  { %1200 = vtanh.f32 %v937_v58 }
 0x975   :  { %v1201_v59 = vpop.eup %1200 }
 0x976   :  { %940 = vrot.lane.b32.xlu0 %v1201_v59, %s1552_s1  ;;  %s972_s1 = sshll.u32 %s1572_s7, 4  ;;  %s973_s1 = int_to_ptr.vmem [resolvable:$true] %s972_s1 }
 0x977   :  { %s1488_s0 = scalar_lea.vmem %s973_s1, 64  ;;  %p1493_p7 = scmp.lt.s32.totalorder %s973_s1, %s973_s1 }
 0x978   :  { %p1489_p6 = scmp.ne.s32.totalorder %s973_s1, %s1488_s0  ;;  %p1494_p8 = scmp.lt.s32.totalorder %s1488_s0, %s1488_s0 }
 0x97a   :  { %945 = vrot.lane.b32.xlu0 %v1895_v56, %s1556_s26  ;;  %p1495_p9 = por %p1494_p8, %p1493_p7 }
 0x97c   :  { %p1496_p10 = pnand %p1495_p9, %p1489_p6 }
 0x97e   :  { %957 = vrot.lane.b32.xlu0 %v1887_v49, %s1571_s12 }
 0x9e8   :  { %v941_v60 = vpop.permute.xlu0 %940 }
 0x9e9   :  { %v943_v61 = vmul.f32 %v1199_v52, %v941_v60 }
 0x9eb   :  { %951 = vrot.lane.b32.xlu1 %v943_v61, %s1556_s26 }
 0x9ec   :  { %v946_v62 = vpop.permute.xlu0 %945 }
 0x9ed   :  { %949 = vst.msk [vmem:[#allocation23] sm:$0x3] %vm948_vm4, %v946_v62 }
 0x9ef   :  { %962 = vrot.lane.b32.xlu1 %v937_v58, %s1571_s12 }
 0x9f0   :  { %v958_v63 = vpop.permute.xlu0 %957 }
 0x9f1   :  { %960 = vst.msk [vmem:[#allocation24] sm:$0x3] %vm948_vm4, %v958_v63 }
 0xa5d   :  { %v952_v1 = vpop.permute.xlu1 %951 }
 0xa5e   :  { %955 = vst.msk [vmem:[#allocation23 + $0x2] sm:$0x3] %vm948_vm4, %v952_v1 }
 0xa5f   :  { %1499 = shalt.err (!%p1496_p10)
}
 0xa60   :  { %s1500_s21 = scalar_lea.hbm %s1984_s13, 64 }
 0xa61   :  { %p1501_p11 = scmp.ne.s32.totalorder %s1984_s13, %s1500_s21  ;;  %p1504_p12 = scmp.lt.u32.totalorder %s1500_s21, %s1984_s13 }
 0xa63   :  { %p1506_p13 = pnand %p1504_p12, %p1501_p11 }
 0xa65   :  { %1509 = shalt.err (!%p1506_p13)
}
 0xa66   :  { %978 = dma.vmem_to_hbm [thread:$0]  %s973_s1, 64, %s1984_s13, [#allocation4], %s1556_s26, %s1556_s26, %s1557_s19   ;;  %v963_v49 = vpop.permute.xlu1 %962 }
 0xa67   :  { %966 = vst.msk [vmem:[#allocation24 + $0x2] sm:$0x3] %vm948_vm4, %v963_v49  ;;  %s1510_s22 = scalar_lea.vmem %s985_s23, 64  ;;  %p1515_p1 = scmp.lt.s32.totalorder %s985_s23, %s985_s23 }
 0xa68   :  { %p1511_p0 = scmp.ne.s32.totalorder %s985_s23, %s1510_s22  ;;  %p1516_p2 = scmp.lt.s32.totalorder %s1510_s22, %s1510_s22 }
 0xa6a   :  { %p1517_p3 = por %p1516_p2, %p1515_p1 }
 0xa6c   :  { %p1518_p4 = pnand %p1517_p3, %p1511_p0 }
 0xa6e   :  { %1521 = shalt.err (!%p1518_p4)
}
 0xa6f   :  { %s1522_s9 = scalar_lea.hbm %s1985_s14, 64 }
 0xa70   :  { %p1523_p5 = scmp.ne.s32.totalorder %s1985_s14, %s1522_s9  ;;  %p1526_p6 = scmp.lt.u32.totalorder %s1522_s9, %s1985_s14 }
 0xa72   :  { %p1528_p7 = pnand %p1526_p6, %p1523_p5 }
 0xa74   :  { %1531 = shalt.err (!%p1528_p7)
}
 0xa75   :  { %990 = dma.vmem_to_hbm [thread:$0]  %s985_s23, 64, %s1985_s14, [#allocation25], %s1556_s26, %s1556_s26, %s1557_s19  }
 0xa76   :  { %1546 = dma.done.wait [#allocation4], 64  }
 0xa77   :  { %1547 = vsyncadd [#allocation4], 4294967232 }
 0xa78   :  { %1548 = dma.done.wait [#allocation25], 64  }
 0xa79   :  { %1549 = vsyncadd [#allocation25], 4294967232 }
 0xa7a   :  { %997 = vsyncpa [#allocation3], 1 }
 0xa7b   :  { %998 = vsyncpa [#allocation6], 1 }
 0xa7c   :  { %999 = vsyncpa [#allocation9], 1 }
 0xa7d   :  { %1000 = vsyncpa [#allocation12], 1 }
 0xa7e   :  { %1001 = vsyncpa [#allocation15], 1 }
 0xa7f   :  { %1002 = vsyncpa [#allocation18], 1 }
 0xa80   :  { %1003 = vsyncpa [#allocation21], 1 }
 0xa81   :  { %1004 = vsyncpa [#allocation4], 1 }
 0xa82   :  { %1005 = vsyncpa [#allocation25], 1 }

</bundles_post_ra>
